<compile_context>
chip_gen: v7x
topology: tpu7x:2x2x1
jax: 0.10.0
libtpu: 0.0.40
codegen_flags: <defaults>
</compile_context>

<pallas_src>
import jax
import jax.numpy as jnp
from jax import lax
from jax.experimental import pallas as pl
from jax.experimental.pallas import tpu as pltpu  # noqa: F401  (TPU backend)

LRELU_SLOPE = 0.2
BN_EPS = 1e-5


# ----------------------------------------------------------------------------
# Fused (im2col-matmul + bias [+ BatchNorm] [+ LeakyReLU]) kernel
# ----------------------------------------------------------------------------
def _make_fused_kernel(apply_bn, apply_act, use_vpu):
    """Kernel refs: x_col, w_col, bias, [gamma, beta], out."""

    def kernel(*refs):
        o_ref = refs[-1]
        x_ref, w_ref, b_ref = refs[0], refs[1], refs[2]

        if use_vpu:
            # Cout == 1: per-pixel multiply + lane reduction (skip the MXU).
            # w_ref is (1, K); x_ref is (M, K).
            z = jnp.sum(
                x_ref[...].astype(jnp.float32) * w_ref[...].astype(jnp.float32),
                axis=-1, keepdims=True)
        else:
            # Single bf16 MXU matmul, f32 accumulation: (M, K) @ (K, Cout).
            z = jnp.dot(x_ref[...], w_ref[...],
                        preferred_element_type=jnp.float32)

        z = z + b_ref[...]

        if apply_bn:
            g_ref, be_ref = refs[3], refs[4]
            m = z.shape[0]                      # M = N*Ho*Wo -> BN batch count
            mean = jnp.sum(z, axis=0, keepdims=True) * (1.0 / m)
            zc = z - mean
            var = jnp.sum(zc * zc, axis=0, keepdims=True) * (1.0 / m)  # biased
            inv = 1.0 / jnp.sqrt(var + BN_EPS)
            z = zc * inv * g_ref[...] + be_ref[...]

        if apply_act:
            z = jnp.where(z >= 0, z, LRELU_SLOPE * z)

        o_ref[...] = z.astype(o_ref.dtype)

    return kernel


def conv3x3_block(x, w, b, gamma=None, beta=None, *, stride,
                  apply_bn, apply_act):
    """3x3 conv (padding=1) fused with optional BN (batch stats) + LeakyReLU.

    x: (N, H, W, Cin) f32;  w: (3, 3, Cin, Cout);  b/gamma/beta: (Cout,)
    Returns (N, Ho, Wo, Cout) f32.
    """
    N, H, W, Cin = x.shape
    Cout = w.shape[-1]
    Ho = (H + 2 - 3) // stride + 1
    Wo = (W + 2 - 3) // stride + 1
    K = 9 * Cin
    M = N * Ho * Wo

    # Wrapper-side im2col (pure data movement, bf16): 9 shifted / decimated
    # slabs concatenated along the channel axis.  Flattening order (kh, kw, c)
    # matches w.reshape(9*Cin, Cout).
    xp = jnp.pad(x, ((0, 0), (1, 1), (1, 1), (0, 0))).astype(jnp.bfloat16)
    cols = []
    for kh in range(3):
        for kw in range(3):
            cols.append(xp[:, kh:kh + stride * (Ho - 1) + 1:stride,
                            kw:kw + stride * (Wo - 1) + 1:stride, :])
    x_col = jnp.concatenate(cols, axis=-1).reshape(M, K)

    w_col = w.astype(jnp.bfloat16).reshape(K, Cout)
    use_vpu = (Cout == 1)
    if use_vpu:
        w_col = w_col.reshape(1, K)   # row vector for the VPU reduction path

    args = [x_col, w_col, b.reshape(1, Cout).astype(jnp.float32)]
    if apply_bn:
        args.append(gamma.reshape(1, Cout).astype(jnp.float32))
        args.append(beta.reshape(1, Cout).astype(jnp.float32))

    out = pl.pallas_call(
        _make_fused_kernel(apply_bn, apply_act, use_vpu),
        out_shape=jax.ShapeDtypeStruct((M, Cout), jnp.float32),
    )(*args)
    return out.reshape(N, Ho, Wo, Cout)


# ----------------------------------------------------------------------------
# Parameters + model
# ----------------------------------------------------------------------------
def init_discriminator_params(key, input_shape):
    in_channels = input_shape[0]
    blocks = []
    cin = in_channels
    for i, cout in enumerate([64, 128, 256, 512]):
        key, k1, k2, k3, k4, k5, k6, k7, k8 = jax.random.split(key, 9)
        blk = dict(
            w1=jax.random.normal(k1, (3, 3, cin, cout), jnp.float32) / jnp.sqrt(9.0 * cin),
            b1=0.01 * jax.random.normal(k2, (cout,), jnp.float32),
            w2=jax.random.normal(k3, (3, 3, cout, cout), jnp.float32) / jnp.sqrt(9.0 * cout),
            b2=0.01 * jax.random.normal(k4, (cout,), jnp.float32),
            g2=1.0 + 0.1 * jax.random.normal(k5, (cout,), jnp.float32),
            be2=0.1 * jax.random.normal(k6, (cout,), jnp.float32),
        )
        if i != 0:  # first block has no BN after its first conv
            blk["g1"] = 1.0 + 0.1 * jax.random.normal(k7, (cout,), jnp.float32)
            blk["be1"] = 0.1 * jax.random.normal(k8, (cout,), jnp.float32)
        blocks.append(blk)
        cin = cout
    key, kf1, kf2 = jax.random.split(key, 3)
    wf = jax.random.normal(kf1, (3, 3, cin, 1), jnp.float32) / jnp.sqrt(9.0 * cin)
    bf = 0.01 * jax.random.normal(kf2, (1,), jnp.float32)
    return dict(blocks=blocks, wf=wf, bf=bf)


def discriminator_forward(img_nchw, params):
    x = jnp.transpose(img_nchw, (0, 2, 3, 1)).astype(jnp.float32)  # NCHW -> NHWC
    for i, blk in enumerate(params["blocks"]):
        x = conv3x3_block(x, blk["w1"], blk["b1"],
                          blk.get("g1"), blk.get("be1"),
                          stride=1, apply_bn=(i != 0), apply_act=True)
        x = conv3x3_block(x, blk["w2"], blk["b2"], blk["g2"], blk["be2"],
                          stride=2, apply_bn=True, apply_act=True)
    x = conv3x3_block(x, params["wf"], params["bf"],
                      stride=1, apply_bn=False, apply_act=False)
    return jnp.transpose(x, (0, 3, 1, 2))  # back to NCHW: (N, 1, H/16, W/16)


# ----------------------------------------------------------------------------
# Pure-JAX reference (bf16 conv inputs, f32 accumulation — same numerics model)
# ----------------------------------------------------------------------------
def _ref_conv(x, w, b, stride):
    out = lax.conv_general_dilated(
        x.astype(jnp.bfloat16), w.astype(jnp.bfloat16),
        window_strides=(stride, stride), padding=((1, 1), (1, 1)),
        dimension_numbers=("NHWC", "HWIO", "NHWC"),
        preferred_element_type=jnp.float32)
    return out + b[None, None, None, :].astype(jnp.float32)


def _lrelu(x):
    return jnp.where(x >= 0, x, LRELU_SLOPE * x)


def _ref_bn_lrelu(x, gamma, beta):
    mean = jnp.mean(x, axis=(0, 1, 2), keepdims=True)
    var = jnp.mean((x - mean) ** 2, axis=(0, 1, 2), keepdims=True)
    y = (x - mean) / jnp.sqrt(var + BN_EPS) * gamma + beta
    return _lrelu(y)


def discriminator_reference(img_nchw, params):
    x = jnp.transpose(img_nchw, (0, 2, 3, 1)).astype(jnp.float32)
    for i, blk in enumerate(params["blocks"]):
        x = _ref_conv(x, blk["w1"], blk["b1"], 1)
        x = _lrelu(x) if i == 0 else _ref_bn_lrelu(x, blk["g1"], blk["be1"])
        x = _ref_conv(x, blk["w2"], blk["b2"], 2)
        x = _ref_bn_lrelu(x, blk["g2"], blk["be2"])
    x = _ref_conv(x, params["wf"], params["bf"], 1)
    return jnp.transpose(x, (0, 3, 1, 2))


if __name__ == "__main__":
    key = jax.random.PRNGKey(0)
    input_shape = (3, 32, 32)   # (C, H, W) — matches the PyTorch module's input_shape
    batch = 2

    kp, kx = jax.random.split(key)
    params = init_discriminator_params(kp, input_shape)
    img = jax.random.normal(kx, (batch,) + input_shape, jnp.float32)  # NCHW

    out = jax.block_until_ready(discriminator_forward(img, params))

    expected_shape = (batch, 1, input_shape[1] // 16, input_shape[2] // 16)
    assert out.shape == expected_shape, (out.shape, expected_shape)

    ref = jax.block_until_ready(discriminator_reference(img, params))
    max_err = float(jnp.max(jnp.abs(out - ref)))
    assert max_err < 1e-2, f"max abs error vs reference: {max_err}"

    print("KERNEL_OK")
</pallas_src>

<mosaic_0001>
module attributes {stable_mosaic.version = 11 : i64} {
  func.func @kernel(%arg0: memref<2048x27xbf16, #tpu.memory_space<vmem>>, %arg1: memref<27x64xbf16, #tpu.memory_space<vmem>>, %arg2: memref<1x64xf32, #tpu.memory_space<vmem>>, %arg3: memref<2048x64xf32, #tpu.memory_space<vmem>>) attributes {dimension_semantics = [], scalar_prefetch = 0 : i64, scratch_operands = 0 : i64, tpu.core_type = #tpu.core_type<tc>} {
    %c0 = arith.constant 0 : index
    %c0_0 = arith.constant 0 : index
    %0 = vector.load %arg0[%c0, %c0_0] : memref<2048x27xbf16, #tpu.memory_space<vmem>>, vector<2048x27xbf16>
    %c0_1 = arith.constant 0 : index
    %c0_2 = arith.constant 0 : index
    %1 = vector.load %arg1[%c0_1, %c0_2] : memref<27x64xbf16, #tpu.memory_space<vmem>>, vector<27x64xbf16>
    %cst = arith.constant dense<0.000000e+00> : vector<2048x64xf32>
    %2 = tpu.matmul %0, %1, %cst {dimension_numbers = #tpu.dot_dimension_numbers<[1], [0], [0], [1], [0, 0, 1, 1], [], []>} : vector<2048x27xbf16>, vector<27x64xbf16>, vector<2048x64xf32> -> vector<2048x64xf32>
    %c0_3 = arith.constant 0 : index
    %c0_4 = arith.constant 0 : index
    %3 = vector.load %arg2[%c0_3, %c0_4] : memref<1x64xf32, #tpu.memory_space<vmem>>, vector<1x64xf32>
    %4 = vector.broadcast %3 : vector<1x64xf32> to vector<2048x64xf32>
    %5 = arith.addf %2, %4 : vector<2048x64xf32>
    %cst_5 = arith.constant 0.000000e+00 : f32
    %6 = vector.broadcast %cst_5 : f32 to vector<2048x64xf32>
    %7 = arith.cmpf oge, %5, %6 : vector<2048x64xf32>
    %cst_6 = arith.constant 2.000000e-01 : f32
    %8 = vector.broadcast %cst_6 : f32 to vector<2048x64xf32>
    %9 = arith.mulf %8, %5 : vector<2048x64xf32>
    %10 = arith.select %7, %5, %9 : vector<2048x64xi1>, vector<2048x64xf32>
    %c0_7 = arith.constant 0 : index
    %c0_8 = arith.constant 0 : index
    %11 = vector.load %arg3[%c0_7, %c0_8] : memref<2048x64xf32, #tpu.memory_space<vmem>>, vector<2048x64xf32>
    tpu.vector_store %arg3[%c0_7, %c0_8], %10 {strides = array<i32>} : memref<2048x64xf32, #tpu.memory_space<vmem>>, vector<2048x64xf32>,
    return
  }
}

</mosaic_0001>

<bundles_post_ra>
// kernel: tpu_custom_call.1
= control target key start
LH: loop header
LB: loop body
LE: loop exit
PB: predicated region body
PF: predicated region fallthrough
CT: control target
= control target key end

     0   :  { %vm1318_vm0 = vcmask 1044480   ;;  %vm1319_vm1 = vcmask 1045504   ;;  %vm933_vm2 = vcmask 220160   ;;  %v4198_v1 = vmov 65535   ;;  %s6035_s1 = inlined_call_operand.vmem [shape: bf16[27,64], index: 1, kind: input, shape index: {}]   ;;  %s6036_s0 = inlined_call_operand.vmem [shape: bf16[2048,27], index: 0, kind: input, shape index: {}]   ;;  %s6037_s2 = inlined_call_operand.vmem [shape: f32[1,64], index: 2, kind: input, shape index: {}]   ;;  %s6038_s3 = inlined_call_operand.vmem [shape: f32[2048,64], index: 3, kind: output, shape index: {}]  }
   0x1   :  { %v4065_v0 = vld [vmem:[%s6035_s1] sm:$0xff]   ;;  %v1320_v2 = vsel %vm1318_vm0, 4294967295, %v4198_v1  ;;  %v4066_v3 = vld [vmem:[%s6035_s1 + $0x8] sm:$0x3f]   ;;  %v4071_v10 = vld [vmem:[%s6036_s0 + $0x10] sm:$0xff]   ;;  %vm3150_vm3 = vcmask 523264  }
   0x2   :  { %3800 = vmatprep.subr.bf16.mxu0 %v4065_v0  ;;  %4060 = vmatprep.subr.bf16.mxu1 %v4065_v0  ;;  %v1321_v4 = vsel %vm1319_vm1, %v1320_v2, 0  ;;  %v4067_v5 = vld [vmem:[%s6036_s0] sm:$0xff]   ;;  %v4069_v8 = vld [vmem:[%s6036_s0 + $0x8] sm:$0xff]   ;;  %v4072_v11 = vld [vmem:[%s6036_s0 + $0x210] sm:$0xff]  }
   0x3   :  { %3801 = vmatpush3.bf16.msra.mxu0 %v4065_v0  ;;  %4062 = vmatpush3.bf16.msra.mxu1 %v4065_v0  ;;  %v1323_v6 = vand.u32 %v4066_v3, %v1321_v4  ;;  %v4068_v7 = vld [vmem:[%s6036_s0 + $0x200] sm:$0xff]   ;;  %v4070_v9 = vld [vmem:[%s6036_s0 + $0x208] sm:$0xff]   ;;  %v4073_v12 = vld [vmem:[%s6036_s0 + $0x18] sm:$0xff]  }
   0x4   :  { %3804 = vmatprep.mubr.msk.bf16.mxu0 %vm933_vm2, %v4067_v5  ;;  %3932 = vmatprep.mubr.msk.bf16.mxu1 %vm933_vm2, %v4068_v7  ;;  %v4074_v13 = vld [vmem:[%s6036_s0 + $0x218] sm:$0xff]   ;;  %v4075_v14 = vld [vmem:[%s6036_s0 + $0x20] sm:$0xff]   ;;  %v4077_v16 = vld [vmem:[%s6036_s0 + $0x28] sm:$0xff]  }
   0x5   :  { %3802 = vmatprep.subr.bf16.mxu0 %v1323_v6  ;;  %4061 = vmatprep.subr.bf16.mxu1 %v1323_v6  ;;  %v4076_v15 = vld [vmem:[%s6036_s0 + $0x220] sm:$0xff]   ;;  %v4078_v17 = vld [vmem:[%s6036_s0 + $0x228] sm:$0xff]   ;;  %v4079_v18 = vld [vmem:[%s6036_s0 + $0x30] sm:$0xff]  }
   0x6   :  { %v4080_v19 = vld [vmem:[%s6036_s0 + $0x230] sm:$0xff]   ;;  %v4081_v20 = vld [vmem:[%s6036_s0 + $0x38] sm:$0xff]   ;;  %v4083_v22 = vld [vmem:[%s6036_s0 + $0x40] sm:$0xff]  }
   0x7   :  { %3803 = vmatpush3.bf16.msra.mxu0 %v1323_v6  ;;  %4063 = vmatpush3.bf16.msra.mxu1 %v1323_v6  ;;  %v4082_v21 = vld [vmem:[%s6036_s0 + $0x238] sm:$0xff]   ;;  %v4084_v23 = vld [vmem:[%s6036_s0 + $0x240] sm:$0xff]   ;;  %v4085_v24 = vld [vmem:[%s6036_s0 + $0x48] sm:$0xff]  }
   0x8   :  { %v4086_v25 = vld [vmem:[%s6036_s0 + $0x248] sm:$0xff]   ;;  %v4087_v26 = vld [vmem:[%s6036_s0 + $0x50] sm:$0xff]   ;;  %v4089_v28 = vld [vmem:[%s6036_s0 + $0x58] sm:$0xff]  }
   0x9   :  { %v4088_v27 = vld [vmem:[%s6036_s0 + $0x250] sm:$0xff]   ;;  %v4090_v29 = vld [vmem:[%s6036_s0 + $0x258] sm:$0xff]   ;;  %v4091_v30 = vld [vmem:[%s6036_s0 + $0x60] sm:$0xff]  }
   0xa   :  { %3805 = vmatmul.mubr.msk.bf16.vlgmr.msra.gmra.mrb[0].mxu0 %vm933_vm2, %v4069_v8  ;;  %3933 = vmatmul.mubr.msk.bf16.vlgmr.msra.gmra.mrb[0].mxu1 %vm933_vm2, %v4070_v9  ;;  %v4092_v31 = vld [vmem:[%s6036_s0 + $0x260] sm:$0xff]   ;;  %v4093_v32 = vld [vmem:[%s6036_s0 + $0x68] sm:$0xff]   ;;  %v4095_v34 = vld [vmem:[%s6036_s0 + $0x70] sm:$0xff]  }
   0xb   :  { %3808 = vmatprep.mubr.msk.bf16.mxu0 %vm933_vm2, %v4071_v10  ;;  %3936 = vmatprep.mubr.msk.bf16.mxu1 %vm933_vm2, %v4072_v11  ;;  %v4094_v33 = vld [vmem:[%s6036_s0 + $0x268] sm:$0xff]   ;;  %v4096_v35 = vld [vmem:[%s6036_s0 + $0x270] sm:$0xff]   ;;  %v4097_v36 = vld [vmem:[%s6036_s0 + $0x78] sm:$0xff]  }
   0xc   :  { %v4098_v37 = vld [vmem:[%s6036_s0 + $0x278] sm:$0xff]   ;;  %v4099_v38 = vld [vmem:[%s6036_s0 + $0x80] sm:$0xff]   ;;  %v4101_v40 = vld [vmem:[%s6036_s0 + $0x88] sm:$0xff]  }
   0xd   :  { %v4100_v39 = vld [vmem:[%s6036_s0 + $0x280] sm:$0xff]   ;;  %v4102_v41 = vld [vmem:[%s6036_s0 + $0x288] sm:$0xff]   ;;  %v4103_v42 = vld [vmem:[%s6036_s0 + $0x90] sm:$0xff]  }
   0xe   :  { %v4104_v43 = vld [vmem:[%s6036_s0 + $0x290] sm:$0xff]   ;;  %v4105_v44 = vld [vmem:[%s6036_s0 + $0x98] sm:$0xff]   ;;  %v4107_v46 = vld [vmem:[%s6036_s0 + $0xa0] sm:$0xff]  }
   0xf   :  { %v4106_v45 = vld [vmem:[%s6036_s0 + $0x298] sm:$0xff]   ;;  %v4108_v47 = vld [vmem:[%s6036_s0 + $0x2a0] sm:$0xff]   ;;  %v4109_v48 = vld [vmem:[%s6036_s0 + $0xa8] sm:$0xff]  }
  0x10   :  { %v4110_v49 = vld [vmem:[%s6036_s0 + $0x2a8] sm:$0xff]   ;;  %v4111_v50 = vld [vmem:[%s6036_s0 + $0xb0] sm:$0xff]   ;;  %v4113_v52 = vld [vmem:[%s6036_s0 + $0xb8] sm:$0xff]  }
  0x11   :  { %v4112_v51 = vld [vmem:[%s6036_s0 + $0x2b0] sm:$0xff]   ;;  %v4114_v53 = vld [vmem:[%s6036_s0 + $0x2b8] sm:$0xff]   ;;  %v4115_v54 = vld [vmem:[%s6036_s0 + $0xc0] sm:$0xff]  }
  0x12   :  { %3809 = vmatmul.mubr.msk.bf16.gmra.mrb[4].mxu0 %vm933_vm2, %v4073_v12  ;;  %3937 = vmatmul.mubr.msk.bf16.gmra.mrb[4].mxu1 %vm933_vm2, %v4074_v13  ;;  %v4116_v55 = vld [vmem:[%s6036_s0 + $0x2c0] sm:$0xff]   ;;  %v4117_v56 = vld [vmem:[%s6036_s0 + $0xc8] sm:$0xff]   ;;  %v4119_v58 = vld [vmem:[%s6036_s0 + $0xd0] sm:$0xff]  }
  0x13   :  { %3812 = vmatprep.mubr.msk.bf16.mxu0 %vm933_vm2, %v4075_v14  ;;  %3940 = vmatprep.mubr.msk.bf16.mxu1 %vm933_vm2, %v4076_v15  ;;  %v4118_v57 = vld [vmem:[%s6036_s0 + $0x2c8] sm:$0xff]   ;;  %v4120_v59 = vld [vmem:[%s6036_s0 + $0x2d0] sm:$0xff]   ;;  %v4121_v60 = vld [vmem:[%s6036_s0 + $0xd8] sm:$0xff]  }
  0x14   :  { %v4122_v61 = vld [vmem:[%s6036_s0 + $0x2d8] sm:$0xff]   ;;  %v4123_v62 = vld [vmem:[%s6036_s0 + $0xe0] sm:$0xff]   ;;  %v4125_v0 = vld [vmem:[%s6036_s0 + $0xe8] sm:$0xff]  }
  0x15   :  { %v4124_v63 = vld [vmem:[%s6036_s0 + $0x2e0] sm:$0xff]   ;;  %v4126_v1 = vld [vmem:[%s6036_s0 + $0x2e8] sm:$0xff]   ;;  %v4127_v2 = vld [vmem:[%s6036_s0 + $0xf0] sm:$0xff]  }
  0x16   :  { %v4128_v3 = vld [vmem:[%s6036_s0 + $0x2f0] sm:$0xff]   ;;  %v4129_v4 = vld [vmem:[%s6036_s0 + $0xf8] sm:$0xff]   ;;  %v4131_v6 = vld [vmem:[%s6036_s0 + $0x100] sm:$0xff]  }
  0x17   :  { %v4130_v5 = vld [vmem:[%s6036_s0 + $0x2f8] sm:$0xff]   ;;  %v4132_v7 = vld [vmem:[%s6036_s0 + $0x300] sm:$0xff]   ;;  %v4133_v8 = vld [vmem:[%s6036_s0 + $0x108] sm:$0xff]  }
  0x18   :  { %v4134_v9 = vld [vmem:[%s6036_s0 + $0x308] sm:$0xff]   ;;  %v4135_v10 = vld [vmem:[%s6036_s0 + $0x110] sm:$0xff]   ;;  %v4137_v12 = vld [vmem:[%s6036_s0 + $0x118] sm:$0xff]  }
  0x19   :  { %v4136_v11 = vld [vmem:[%s6036_s0 + $0x310] sm:$0xff]   ;;  %v4138_v13 = vld [vmem:[%s6036_s0 + $0x318] sm:$0xff]   ;;  %v4139_v14 = vld [vmem:[%s6036_s0 + $0x120] sm:$0xff]  }
  0x1a   :  { %3813 = vmatmul.mubr.msk.bf16.gmra.mrb[8].mxu0 %vm933_vm2, %v4077_v16  ;;  %3941 = vmatmul.mubr.msk.bf16.gmra.mrb[8].mxu1 %vm933_vm2, %v4078_v17  ;;  %v4140_v15 = vld [vmem:[%s6036_s0 + $0x320] sm:$0xff]   ;;  %v4141_v16 = vld [vmem:[%s6036_s0 + $0x128] sm:$0xff]  }
  0x1b   :  { %3816 = vmatprep.mubr.msk.bf16.mxu0 %vm933_vm2, %v4079_v18  ;;  %3944 = vmatprep.mubr.msk.bf16.mxu1 %vm933_vm2, %v4080_v19  ;;  %v4142_v17 = vld [vmem:[%s6036_s0 + $0x328] sm:$0xff]   ;;  %v4143_v18 = vld [vmem:[%s6036_s0 + $0x130] sm:$0xff]  }
  0x1c   :  { %v4144_v19 = vld [vmem:[%s6036_s0 + $0x330] sm:$0xff]  }
  0x22   :  { %3817 = vmatmul.mubr.msk.bf16.gmra.mrb[12].mxu0 %vm933_vm2, %v4081_v20  ;;  %3945 = vmatmul.mubr.msk.bf16.gmra.mrb[12].mxu1 %vm933_vm2, %v4082_v21  ;;  %v4145_v20 = vld [vmem:[%s6036_s0 + $0x138] sm:$0xff]  }
  0x23   :  { %3820 = vmatprep.mubr.msk.bf16.mxu0 %vm933_vm2, %v4083_v22  ;;  %3948 = vmatprep.mubr.msk.bf16.mxu1 %vm933_vm2, %v4084_v23  ;;  %v4146_v21 = vld [vmem:[%s6036_s0 + $0x338] sm:$0xff]   ;;  %v4147_v22 = vld [vmem:[%s6036_s0 + $0x140] sm:$0xff]  }
  0x24   :  { %v4148_v23 = vld [vmem:[%s6036_s0 + $0x340] sm:$0xff]  }
  0x2a   :  { %3821 = vmatmul.mubr.msk.bf16.gmra.mrb[16].mxu0 %vm933_vm2, %v4085_v24  ;;  %3949 = vmatmul.mubr.msk.bf16.gmra.mrb[16].mxu1 %vm933_vm2, %v4086_v25  ;;  %v4149_v24 = vld [vmem:[%s6036_s0 + $0x148] sm:$0xff]  }
  0x2b   :  { %3824 = vmatprep.mubr.msk.bf16.mxu0 %vm933_vm2, %v4087_v26  ;;  %3952 = vmatprep.mubr.msk.bf16.mxu1 %vm933_vm2, %v4088_v27  ;;  %v4150_v25 = vld [vmem:[%s6036_s0 + $0x348] sm:$0xff]   ;;  %v4151_v26 = vld [vmem:[%s6036_s0 + $0x150] sm:$0xff]  }
  0x2c   :  { %v4152_v27 = vld [vmem:[%s6036_s0 + $0x350] sm:$0xff]  }
  0x32   :  { %3825 = vmatmul.mubr.msk.bf16.gmra.mrb[20].mxu0 %vm933_vm2, %v4089_v28  ;;  %3953 = vmatmul.mubr.msk.bf16.gmra.mrb[20].mxu1 %vm933_vm2, %v4090_v29  ;;  %v4153_v28 = vld [vmem:[%s6036_s0 + $0x158] sm:$0xff]  }
  0x33   :  { %3828 = vmatprep.mubr.msk.bf16.mxu0 %vm933_vm2, %v4091_v30  ;;  %3956 = vmatprep.mubr.msk.bf16.mxu1 %vm933_vm2, %v4092_v31  ;;  %v4154_v29 = vld [vmem:[%s6036_s0 + $0x358] sm:$0xff]   ;;  %v4155_v30 = vld [vmem:[%s6036_s0 + $0x160] sm:$0xff]  }
  0x34   :  { %v4156_v31 = vld [vmem:[%s6036_s0 + $0x360] sm:$0xff]  }
  0x3a   :  { %3829 = vmatmul.mubr.msk.bf16.gmra.mrb[24].mxu0 %vm933_vm2, %v4093_v32  ;;  %3957 = vmatmul.mubr.msk.bf16.gmra.mrb[24].mxu1 %vm933_vm2, %v4094_v33  ;;  %v4157_v32 = vld [vmem:[%s6036_s0 + $0x168] sm:$0xff]  }
  0x3b   :  { %3832 = vmatprep.mubr.msk.bf16.mxu0 %vm933_vm2, %v4095_v34  ;;  %3960 = vmatprep.mubr.msk.bf16.mxu1 %vm933_vm2, %v4096_v35  ;;  %v4158_v33 = vld [vmem:[%s6036_s0 + $0x368] sm:$0xff]   ;;  %v4159_v34 = vld [vmem:[%s6036_s0 + $0x170] sm:$0xff]  }
  0x3c   :  { %v4160_v35 = vld [vmem:[%s6036_s0 + $0x370] sm:$0xff]  }
  0x42   :  { %3833 = vmatmul.mubr.msk.bf16.gmra.mrb[28].mxu0 %vm933_vm2, %v4097_v36  ;;  %3961 = vmatmul.mubr.msk.bf16.gmra.mrb[28].mxu1 %vm933_vm2, %v4098_v37  ;;  %v4161_v36 = vld [vmem:[%s6036_s0 + $0x178] sm:$0xff]  }
  0x43   :  { %3836 = vmatprep.mubr.msk.bf16.mxu0 %vm933_vm2, %v4099_v38  ;;  %3964 = vmatprep.mubr.msk.bf16.mxu1 %vm933_vm2, %v4100_v39  ;;  %v4162_v37 = vld [vmem:[%s6036_s0 + $0x378] sm:$0xff]   ;;  %v4163_v38 = vld [vmem:[%s6036_s0 + $0x180] sm:$0xff]  }
  0x44   :  { %v4164_v39 = vld [vmem:[%s6036_s0 + $0x380] sm:$0xff]  }
  0x4a   :  { %3837 = vmatmul.mubr.msk.bf16.gmra.mrb[32].mxu0 %vm933_vm2, %v4101_v40  ;;  %3965 = vmatmul.mubr.msk.bf16.gmra.mrb[32].mxu1 %vm933_vm2, %v4102_v41  ;;  %v4165_v40 = vld [vmem:[%s6036_s0 + $0x188] sm:$0xff]  }
  0x4b   :  { %3840 = vmatprep.mubr.msk.bf16.mxu0 %vm933_vm2, %v4103_v42  ;;  %3968 = vmatprep.mubr.msk.bf16.mxu1 %vm933_vm2, %v4104_v43  ;;  %v4166_v41 = vld [vmem:[%s6036_s0 + $0x388] sm:$0xff]   ;;  %v4167_v42 = vld [vmem:[%s6036_s0 + $0x190] sm:$0xff]  }
  0x4c   :  { %v4168_v43 = vld [vmem:[%s6036_s0 + $0x390] sm:$0xff]  }
  0x52   :  { %3841 = vmatmul.mubr.msk.bf16.gmra.mrb[36].mxu0 %vm933_vm2, %v4105_v44  ;;  %3969 = vmatmul.mubr.msk.bf16.gmra.mrb[36].mxu1 %vm933_vm2, %v4106_v45  ;;  %v4169_v44 = vld [vmem:[%s6036_s0 + $0x198] sm:$0xff]  }
  0x53   :  { %3844 = vmatprep.mubr.msk.bf16.mxu0 %vm933_vm2, %v4107_v46  ;;  %3972 = vmatprep.mubr.msk.bf16.mxu1 %vm933_vm2, %v4108_v47  ;;  %v4170_v45 = vld [vmem:[%s6036_s0 + $0x398] sm:$0xff]   ;;  %v4171_v46 = vld [vmem:[%s6036_s0 + $0x1a0] sm:$0xff]  }
  0x54   :  { %v4172_v47 = vld [vmem:[%s6036_s0 + $0x3a0] sm:$0xff]  }
  0x5a   :  { %3845 = vmatmul.mubr.msk.bf16.gmra.mrb[40].mxu0 %vm933_vm2, %v4109_v48  ;;  %3973 = vmatmul.mubr.msk.bf16.gmra.mrb[40].mxu1 %vm933_vm2, %v4110_v49  ;;  %v4173_v48 = vld [vmem:[%s6036_s0 + $0x1a8] sm:$0xff]  }
  0x5b   :  { %3848 = vmatprep.mubr.msk.bf16.mxu0 %vm933_vm2, %v4111_v50  ;;  %3976 = vmatprep.mubr.msk.bf16.mxu1 %vm933_vm2, %v4112_v51  ;;  %v4174_v49 = vld [vmem:[%s6036_s0 + $0x3a8] sm:$0xff]   ;;  %v4175_v50 = vld [vmem:[%s6036_s0 + $0x1b0] sm:$0xff]  }
  0x5c   :  { %v4176_v51 = vld [vmem:[%s6036_s0 + $0x3b0] sm:$0xff]  }
  0x62   :  { %3849 = vmatmul.mubr.msk.bf16.gmra.mrb[44].mxu0 %vm933_vm2, %v4113_v52  ;;  %3977 = vmatmul.mubr.msk.bf16.gmra.mrb[44].mxu1 %vm933_vm2, %v4114_v53  ;;  %v4666_v52 = vld [vmem:[%s6037_s2] ss:$0 sm:$0xff] }
  0x63   :  { %3852 = vmatprep.mubr.msk.bf16.mxu0 %vm933_vm2, %v4115_v54  ;;  %3980 = vmatprep.mubr.msk.bf16.mxu1 %vm933_vm2, %v4116_v55 }
  0x6a   :  { %3853 = vmatmul.mubr.msk.bf16.gmra.mrb[48].mxu0 %vm933_vm2, %v4117_v56  ;;  %3981 = vmatmul.mubr.msk.bf16.gmra.mrb[48].mxu1 %vm933_vm2, %v4118_v57 }
  0x6b   :  { %3856 = vmatprep.mubr.msk.bf16.mxu0 %vm933_vm2, %v4119_v58  ;;  %3984 = vmatprep.mubr.msk.bf16.mxu1 %vm933_vm2, %v4120_v59  ;;  %v4177_v59 = vld [vmem:[%s6036_s0 + $0x1b8] sm:$0xff]  }
  0x72   :  { %3857 = vmatmul.mubr.msk.bf16.gmra.mrb[52].mxu0 %vm933_vm2, %v4121_v60  ;;  %3985 = vmatmul.mubr.msk.bf16.gmra.mrb[52].mxu1 %vm933_vm2, %v4122_v61 }
  0x73   :  { %3860 = vmatprep.mubr.msk.bf16.mxu0 %vm933_vm2, %v4123_v62  ;;  %3988 = vmatprep.mubr.msk.bf16.mxu1 %vm933_vm2, %v4124_v63 }
  0x7a   :  { %3861 = vmatmul.mubr.msk.bf16.gmra.mrb[56].mxu0 %vm933_vm2, %v4125_v0  ;;  %3989 = vmatmul.mubr.msk.bf16.gmra.mrb[56].mxu1 %vm933_vm2, %v4126_v1  ;;  %v4178_v0 = vld [vmem:[%s6036_s0 + $0x3b8] sm:$0xff]   ;;  %v4179_v1 = vld [vmem:[%s6036_s0 + $0x1c0] sm:$0xff]  }
  0x7b   :  { %3864 = vmatprep.mubr.msk.bf16.mxu0 %vm933_vm2, %v4127_v2  ;;  %3992 = vmatprep.mubr.msk.bf16.mxu1 %vm933_vm2, %v4128_v3  ;;  %v4180_v2 = vld [vmem:[%s6036_s0 + $0x3c0] sm:$0xff]  }
  0x82   :  { %3865 = vmatmul.mubr.msk.bf16.gmra.mrb[60].mxu0 %vm933_vm2, %v4129_v4  ;;  %3993 = vmatmul.mubr.msk.bf16.gmra.mrb[60].mxu1 %vm933_vm2, %v4130_v5 }
  0x83   :  { %3868 = vmatprep.mubr.msk.bf16.mxu0 %vm933_vm2, %v4131_v6  ;;  %3996 = vmatprep.mubr.msk.bf16.mxu1 %vm933_vm2, %v4132_v7 }
  0x8a   :  { %3869 = vmatmul.mubr.msk.bf16.gmra.mrb[64].mxu0 %vm933_vm2, %v4133_v8  ;;  %3997 = vmatmul.mubr.msk.bf16.gmra.mrb[64].mxu1 %vm933_vm2, %v4134_v9 }
  0x8b   :  { %3872 = vmatprep.mubr.msk.bf16.mxu0 %vm933_vm2, %v4135_v10  ;;  %4000 = vmatprep.mubr.msk.bf16.mxu1 %vm933_vm2, %v4136_v11 }
  0x92   :  { %3873 = vmatmul.mubr.msk.bf16.gmra.mrb[68].mxu0 %vm933_vm2, %v4137_v12  ;;  %4001 = vmatmul.mubr.msk.bf16.gmra.mrb[68].mxu1 %vm933_vm2, %v4138_v13 }
  0x93   :  { %3876 = vmatprep.mubr.msk.bf16.mxu0 %vm933_vm2, %v4139_v14  ;;  %4004 = vmatprep.mubr.msk.bf16.mxu1 %vm933_vm2, %v4140_v15 }
  0x9a   :  { %3877 = vmatmul.mubr.msk.bf16.gmra.mrb[72].mxu0 %vm933_vm2, %v4141_v16  ;;  %4005 = vmatmul.mubr.msk.bf16.gmra.mrb[72].mxu1 %vm933_vm2, %v4142_v17 }
  0x9b   :  { %3880 = vmatprep.mubr.msk.bf16.mxu0 %vm933_vm2, %v4143_v18  ;;  %4008 = vmatprep.mubr.msk.bf16.mxu1 %vm933_vm2, %v4144_v19 }
  0xa2   :  { %3881 = vmatmul.mubr.msk.bf16.gmra.mrb[76].mxu0 %vm933_vm2, %v4145_v20  ;;  %4009 = vmatmul.mubr.msk.bf16.gmra.mrb[76].mxu1 %vm933_vm2, %v4146_v21 }
  0xa3   :  { %3884 = vmatprep.mubr.msk.bf16.mxu0 %vm933_vm2, %v4147_v22  ;;  %4012 = vmatprep.mubr.msk.bf16.mxu1 %vm933_vm2, %v4148_v23 }
  0xaa   :  { %3885 = vmatmul.mubr.msk.bf16.gmra.mrb[80].mxu0 %vm933_vm2, %v4149_v24  ;;  %4013 = vmatmul.mubr.msk.bf16.gmra.mrb[80].mxu1 %vm933_vm2, %v4150_v25  ;;  %v4181_v25 = vld [vmem:[%s6036_s0 + $0x1c8] sm:$0xff]  }
  0xab   :  { %3888 = vmatprep.mubr.msk.bf16.mxu0 %vm933_vm2, %v4151_v26  ;;  %4016 = vmatprep.mubr.msk.bf16.mxu1 %vm933_vm2, %v4152_v27 }
  0xb2   :  { %3889 = vmatmul.mubr.msk.bf16.gmra.mrb[84].mxu0 %vm933_vm2, %v4153_v28  ;;  %4017 = vmatmul.mubr.msk.bf16.gmra.mrb[84].mxu1 %vm933_vm2, %v4154_v29 }
  0xb3   :  { %3892 = vmatprep.mubr.msk.bf16.mxu0 %vm933_vm2, %v4155_v30  ;;  %4020 = vmatprep.mubr.msk.bf16.mxu1 %vm933_vm2, %v4156_v31 }
  0xba   :  { %3893 = vmatmul.mubr.msk.bf16.gmra.mrb[88].mxu0 %vm933_vm2, %v4157_v32  ;;  %4021 = vmatmul.mubr.msk.bf16.gmra.mrb[88].mxu1 %vm933_vm2, %v4158_v33  ;;  %v4182_v32 = vld [vmem:[%s6036_s0 + $0x3c8] sm:$0xff]  }
  0xbb   :  { %3896 = vmatprep.mubr.msk.bf16.mxu0 %vm933_vm2, %v4159_v34  ;;  %4024 = vmatprep.mubr.msk.bf16.mxu1 %vm933_vm2, %v4160_v35 }
  0xc2   :  { %3897 = vmatmul.mubr.msk.bf16.gmra.mrb[92].mxu0 %vm933_vm2, %v4161_v36  ;;  %4025 = vmatmul.mubr.msk.bf16.gmra.mrb[92].mxu1 %vm933_vm2, %v4162_v37  ;;  %v4183_v37 = vld [vmem:[%s6036_s0 + $0x1d0] sm:$0xff]  }
  0xc3   :  { %3900 = vmatprep.mubr.msk.bf16.mxu0 %vm933_vm2, %v4163_v38  ;;  %4028 = vmatprep.mubr.msk.bf16.mxu1 %vm933_vm2, %v4164_v39  ;;  %v4184_v38 = vld [vmem:[%s6036_s0 + $0x3d0] sm:$0xff]  }
  0xca   :  { %3901 = vmatmul.mubr.msk.bf16.gmra.mrb[96].mxu0 %vm933_vm2, %v4165_v40  ;;  %4029 = vmatmul.mubr.msk.bf16.gmra.mrb[96].mxu1 %vm933_vm2, %v4166_v41 }
  0xcb   :  { %3904 = vmatprep.mubr.msk.bf16.mxu0 %vm933_vm2, %v4167_v42  ;;  %4032 = vmatprep.mubr.msk.bf16.mxu1 %vm933_vm2, %v4168_v43 }
  0xd2   :  { %3905 = vmatmul.mubr.msk.bf16.gmra.mrb[100].mxu0 %vm933_vm2, %v4169_v44  ;;  %4033 = vmatmul.mubr.msk.bf16.gmra.mrb[100].mxu1 %vm933_vm2, %v4170_v45 }
  0xd3   :  { %3908 = vmatprep.mubr.msk.bf16.mxu0 %vm933_vm2, %v4171_v46  ;;  %4036 = vmatprep.mubr.msk.bf16.mxu1 %vm933_vm2, %v4172_v47 }
  0xda   :  { %3909 = vmatmul.mubr.msk.bf16.gmra.mrb[104].mxu0 %vm933_vm2, %v4173_v48  ;;  %4037 = vmatmul.mubr.msk.bf16.gmra.mrb[104].mxu1 %vm933_vm2, %v4174_v49 }
  0xdb   :  { %3912 = vmatprep.mubr.msk.bf16.mxu0 %vm933_vm2, %v4175_v50  ;;  %4040 = vmatprep.mubr.msk.bf16.mxu1 %vm933_vm2, %v4176_v51 }
  0xdd   :  { %v3806_v53 = vpop.f32.mrb[0].mxu0  ;;  %v3934_v54 = vpop.f32.mrb[0].mxu1 }
  0xde   :  { %v1368_v55 = vadd.f32 %v3806_v53, %v4666_v52  ;;  %v1880_v56 = vadd.f32 %v3934_v54, %v4666_v52  ;;  %v1359_v57 = vpop.f32.mrb[1].mxu0  ;;  %v1871_v58 = vpop.f32.mrb[1].mxu1  ;;  %v4185_v54 = vld [vmem:[%s6036_s0 + $0x1d8] sm:$0xff]  }
  0xdf   :  { %v1360_v60 = vadd.f32 %v4666_v52, %v1359_v57  ;;  %v1872_v61 = vadd.f32 %v4666_v52, %v1871_v58  ;;  %v3807_v62 = vpop.f32.mrb[2].mxu0  ;;  %v3935_v63 = vpop.f32.mrb[2].mxu1 }
  0xe0   :  { %vm2384_vm4 = vcmp.ge.f32.partialorder %v1368_v55, 0.0  ;;  %v2640_v3 = vmul.f32 0.2, %v1368_v55  ;;  %vm2512_vm5 = vcmp.ge.f32.partialorder %v1880_v56, 0.0  ;;  %v2768_v4 = vmul.f32 0.2, %v1880_v56 }
  0xe1   :  { %vm2382_vm6 = vcmp.ge.f32.partialorder %v1360_v60, 0.0  ;;  %v2638_v5 = vmul.f32 0.2, %v1360_v60  ;;  %vm2510_vm7 = vcmp.ge.f32.partialorder %v1872_v61, 0.0  ;;  %v2766_v6 = vmul.f32 0.2, %v1872_v61 }
  0xe2   :  { %v2896_v7 = vsel %vm2384_vm4, %v1368_v55, %v2640_v3  ;;  %v3024_v8 = vsel %vm2512_vm5, %v1880_v56, %v2768_v4  ;;  %v1371_v9 = vadd.f32 %v3807_v62, %v4666_v52  ;;  %v1883_v10 = vadd.f32 %v3935_v63, %v4666_v52  ;;  %v1362_v11 = vpop.f32.mrb[3].mxu0  ;;  %v1874_v12 = vpop.f32.mrb[3].mxu1  ;;  %3913 = vmatmul.mubr.msk.bf16.gmra.mrb[108].mxu0 %vm933_vm2, %v4177_v59  ;;  %v4186_v63 = vld [vmem:[%s6036_s0 + $0x3d8] sm:$0xff]  }
  0xe3   :  { %3153 = vst.msk [vmem:[%s6038_s3 + $0x10] sm:$0xff] %vm3150_vm3, %v2896_v7  ;;  %3281 = vst.msk [vmem:[%s6038_s3 + $0x410] sm:$0xff] %vm3150_vm3, %v3024_v8  ;;  %v2894_v13 = vsel %vm2382_vm6, %v1360_v60, %v2638_v5  ;;  %v3022_v14 = vsel %vm2510_vm7, %v1872_v61, %v2766_v6  ;;  %v1363_v15 = vadd.f32 %v4666_v52, %v1362_v11  ;;  %4041 = vmatmul.mubr.msk.bf16.gmra.mrb[108].mxu1 %vm933_vm2, %v4178_v0  ;;  %v4187_v0 = vld [vmem:[%s6036_s0 + $0x1e0] sm:$0xff]  }
  0xe4   :  { %v1875_v16 = vadd.f32 %v4666_v52, %v1874_v12  ;;  %3151 = vst.msk [vmem:[%s6038_s3] sm:$0xff] %vm3150_vm3, %v2894_v13  ;;  %3279 = vst.msk [vmem:[%s6038_s3 + $0x400] sm:$0xff] %vm3150_vm3, %v3022_v14  ;;  %vm2385_vm8 = vcmp.ge.f32.partialorder %v1371_v9, 0.0  ;;  %v2641_v17 = vmul.f32 0.2, %v1371_v9  ;;  %vm2513_vm9 = vcmp.ge.f32.partialorder %v1883_v10, 0.0  ;;  %3916 = vmatprep.mubr.msk.bf16.mxu0 %vm933_vm2, %v4179_v1  ;;  %4044 = vmatprep.mubr.msk.bf16.mxu1 %vm933_vm2, %v4180_v2 }
  0xe5   :  { %v2769_v18 = vmul.f32 0.2, %v1883_v10  ;;  %vm2383_vm10 = vcmp.ge.f32.partialorder %v1363_v15, 0.0  ;;  %v2639_v19 = vmul.f32 0.2, %v1363_v15  ;;  %v3810_v23 = vpop.f32.mrb[4].mxu0 }
  0xe6   :  { %vm2511_vm11 = vcmp.ge.f32.partialorder %v1875_v16, 0.0  ;;  %v2767_v20 = vmul.f32 0.2, %v1875_v16  ;;  %v2897_v21 = vsel %vm2385_vm8, %v1371_v9, %v2641_v17  ;;  %v3938_v24 = vpop.f32.mrb[4].mxu1  ;;  %v1384_v28 = vadd.f32 %v3810_v23, %v4666_v52  ;;  %v1375_v30 = vpop.f32.mrb[5].mxu0  ;;  %v4188_v7 = vld [vmem:[%s6036_s0 + $0x3e0] sm:$0xff]  }
  0xe7   :  { %v3025_v22 = vsel %vm2513_vm9, %v1883_v10, %v2769_v18  ;;  %3154 = vst.msk [vmem:[%s6038_s3 + $0x18] sm:$0xff] %vm3150_vm3, %v2897_v21  ;;  %v2895_v26 = vsel %vm2383_vm10, %v1363_v15, %v2639_v19  ;;  %v1896_v29 = vadd.f32 %v3938_v24, %v4666_v52  ;;  %v1887_v31 = vpop.f32.mrb[5].mxu1  ;;  %v1376_v33 = vadd.f32 %v4666_v52, %v1375_v30  ;;  %v3811_v35 = vpop.f32.mrb[6].mxu0  ;;  %v4191_v30 = vld [vmem:[%s6036_s0 + $0x1f0] sm:$0xff]  }
  0xe8   :  { %3282 = vst.msk [vmem:[%s6038_s3 + $0x418] sm:$0xff] %vm3150_vm3, %v3025_v22  ;;  %v3023_v27 = vsel %vm2511_vm11, %v1875_v16, %v2767_v20  ;;  %3152 = vst.msk [vmem:[%s6038_s3 + $0x8] sm:$0xff] %vm3150_vm3, %v2895_v26  ;;  %v1888_v34 = vadd.f32 %v4666_v52, %v1887_v31  ;;  %v3939_v36 = vpop.f32.mrb[6].mxu1  ;;  %vm2388_vm12 = vcmp.ge.f32.partialorder %v1384_v28, 0.0  ;;  %v2644_v39 = vmul.f32 0.2, %v1384_v28 }
  0xe9   :  { %3280 = vst.msk [vmem:[%s6038_s3 + $0x408] sm:$0xff] %vm3150_vm3, %v3023_v27  ;;  %vm2516_vm13 = vcmp.ge.f32.partialorder %v1896_v29, 0.0  ;;  %v2772_v40 = vmul.f32 0.2, %v1896_v29  ;;  %vm2386_vm14 = vcmp.ge.f32.partialorder %v1376_v33, 0.0  ;;  %v1387_v45 = vadd.f32 %v3811_v35, %v4666_v52  ;;  %v1378_v47 = vpop.f32.mrb[7].mxu0 }
  0xea   :  { %v2642_v41 = vmul.f32 0.2, %v1376_v33  ;;  %vm2514_vm15 = vcmp.ge.f32.partialorder %v1888_v34, 0.0  ;;  %v2770_v42 = vmul.f32 0.2, %v1888_v34  ;;  %3917 = vmatmul.mubr.msk.bf16.gmra.mrb[112].mxu0 %vm933_vm2, %v4181_v25  ;;  %v2900_v43 = vsel %vm2388_vm12, %v1384_v28, %v2644_v39  ;;  %v1890_v48 = vpop.f32.mrb[7].mxu1 }
  0xeb   :  { %v3028_v44 = vsel %vm2516_vm13, %v1896_v29, %v2772_v40  ;;  %v1899_v46 = vadd.f32 %v3939_v36, %v4666_v52  ;;  %4045 = vmatmul.mubr.msk.bf16.gmra.mrb[112].mxu1 %vm933_vm2, %v4182_v32  ;;  %3157 = vst.msk [vmem:[%s6038_s3 + $0x30] sm:$0xff] %vm3150_vm3, %v2900_v43  ;;  %v1379_v51 = vadd.f32 %v4666_v52, %v1378_v47  ;;  %vm2389_vm0 = vcmp.ge.f32.partialorder %v1387_v45, 0.0  ;;  %v4189_v28 = vld [vmem:[%s6036_s0 + $0x1e8] sm:$0xff]  }
  0xec   :  { %3285 = vst.msk [vmem:[%s6038_s3 + $0x430] sm:$0xff] %vm3150_vm3, %v3028_v44  ;;  %v2898_v49 = vsel %vm2386_vm14, %v1376_v33, %v2642_v41  ;;  %v3026_v50 = vsel %vm2514_vm15, %v1888_v34, %v2770_v42  ;;  %v1891_v53 = vadd.f32 %v4666_v52, %v1890_v48  ;;  %3920 = vmatprep.mubr.msk.bf16.mxu0 %vm933_vm2, %v4183_v37  ;;  %v2645_v55 = vmul.f32 0.2, %v1387_v45  ;;  %v4190_v29 = vld [vmem:[%s6036_s0 + $0x3e8] sm:$0xff]   ;;  %v4192_v41 = vld [vmem:[%s6036_s0 + $0x3f0] sm:$0xff]  }
  0xed   :  { %3155 = vst.msk [vmem:[%s6038_s3 + $0x20] sm:$0xff] %vm3150_vm3, %v2898_v49  ;;  %3283 = vst.msk [vmem:[%s6038_s3 + $0x420] sm:$0xff] %vm3150_vm3, %v3026_v50  ;;  %vm2517_vm1 = vcmp.ge.f32.partialorder %v1899_v46, 0.0  ;;  %v2773_v56 = vmul.f32 0.2, %v1899_v46  ;;  %4048 = vmatprep.mubr.msk.bf16.mxu1 %vm933_vm2, %v4184_v38  ;;  %vm2387_vm4 = vcmp.ge.f32.partialorder %v1379_v51, 0.0 }
  0xee   :  { %v2643_v57 = vmul.f32 0.2, %v1379_v51  ;;  %vm2515_vm5 = vcmp.ge.f32.partialorder %v1891_v53, 0.0  ;;  %v2771_v58 = vmul.f32 0.2, %v1891_v53  ;;  %v2901_v59 = vsel %vm2389_vm0, %v1387_v45, %v2645_v55  ;;  %v3814_v61 = vpop.f32.mrb[8].mxu0 }
  0xef   :  { %v3029_v60 = vsel %vm2517_vm1, %v1899_v46, %v2773_v56  ;;  %v3942_v62 = vpop.f32.mrb[8].mxu1  ;;  %3158 = vst.msk [vmem:[%s6038_s3 + $0x38] sm:$0xff] %vm3150_vm3, %v2901_v59  ;;  %v1400_v3 = vadd.f32 %v3814_v61, %v4666_v52  ;;  %v1391_v5 = vpop.f32.mrb[9].mxu0 }
  0xf0   :  { %3286 = vst.msk [vmem:[%s6038_s3 + $0x438] sm:$0xff] %vm3150_vm3, %v3029_v60  ;;  %v2899_v1 = vsel %vm2387_vm4, %v1379_v51, %v2643_v57  ;;  %v3027_v2 = vsel %vm2515_vm5, %v1891_v53, %v2771_v58  ;;  %v1912_v4 = vadd.f32 %v3942_v62, %v4666_v52  ;;  %v1903_v6 = vpop.f32.mrb[9].mxu1  ;;  %v1392_v8 = vadd.f32 %v4666_v52, %v1391_v5  ;;  %v3815_v10 = vpop.f32.mrb[10].mxu0 }
  0xf1   :  { %3156 = vst.msk [vmem:[%s6038_s3 + $0x28] sm:$0xff] %vm3150_vm3, %v2899_v1  ;;  %3284 = vst.msk [vmem:[%s6038_s3 + $0x428] sm:$0xff] %vm3150_vm3, %v3027_v2  ;;  %v1904_v9 = vadd.f32 %v4666_v52, %v1903_v6  ;;  %v3943_v11 = vpop.f32.mrb[10].mxu1  ;;  %vm2392_vm6 = vcmp.ge.f32.partialorder %v1400_v3, 0.0  ;;  %v2648_v12 = vmul.f32 0.2, %v1400_v3  ;;  %v1403_v18 = vadd.f32 %v3815_v10, %v4666_v52 }
  0xf2   :  { %vm2520_vm7 = vcmp.ge.f32.partialorder %v1912_v4, 0.0  ;;  %v2776_v13 = vmul.f32 0.2, %v1912_v4  ;;  %3921 = vmatmul.mubr.msk.bf16.gmra.mrb[116].mxu0 %vm933_vm2, %v4185_v54  ;;  %vm2390_vm8 = vcmp.ge.f32.partialorder %v1392_v8, 0.0  ;;  %v2646_v14 = vmul.f32 0.2, %v1392_v8 }
  0xf3   :  { %vm2518_vm9 = vcmp.ge.f32.partialorder %v1904_v9, 0.0  ;;  %v2774_v15 = vmul.f32 0.2, %v1904_v9  ;;  %4049 = vmatmul.mubr.msk.bf16.gmra.mrb[116].mxu1 %vm933_vm2, %v4186_v63  ;;  %3924 = vmatprep.mubr.msk.bf16.mxu0 %vm933_vm2, %v4187_v0  ;;  %v2904_v16 = vsel %vm2392_vm6, %v1400_v3, %v2648_v12  ;;  %v1915_v19 = vadd.f32 %v3943_v11, %v4666_v52  ;;  %v1394_v20 = vpop.f32.mrb[11].mxu0  ;;  %v1906_v21 = vpop.f32.mrb[11].mxu1  ;;  %v4193_v1 = vld [vmem:[%s6036_s0 + $0x1f8] sm:$0xff]  }
  0xf4   :  { %v3032_v17 = vsel %vm2520_vm7, %v1912_v4, %v2776_v13  ;;  %4052 = vmatprep.mubr.msk.bf16.mxu1 %vm933_vm2, %v4188_v7  ;;  %3161 = vst.msk [vmem:[%s6038_s3 + $0x50] sm:$0xff] %vm3150_vm3, %v2904_v16  ;;  %v2902_v22 = vsel %vm2390_vm8, %v1392_v8, %v2646_v14  ;;  %v1395_v24 = vadd.f32 %v4666_v52, %v1394_v20  ;;  %vm2393_vm10 = vcmp.ge.f32.partialorder %v1403_v18, 0.0  ;;  %v4194_v2 = vld [vmem:[%s6036_s0 + $0x3f8] sm:$0xff]  }
  0xf5   :  { %3289 = vst.msk [vmem:[%s6038_s3 + $0x450] sm:$0xff] %vm3150_vm3, %v3032_v17  ;;  %v3030_v23 = vsel %vm2518_vm9, %v1904_v9, %v2774_v15  ;;  %v1907_v25 = vadd.f32 %v4666_v52, %v1906_v21  ;;  %v3818_v26 = vpop.f32.mrb[12].mxu0  ;;  %v3946_v27 = vpop.f32.mrb[12].mxu1  ;;  %3159 = vst.msk [vmem:[%s6038_s3 + $0x40] sm:$0xff] %vm3150_vm3, %v2902_v22  ;;  %v2649_v31 = vmul.f32 0.2, %v1403_v18 }
  0xf6   :  { %3287 = vst.msk [vmem:[%s6038_s3 + $0x440] sm:$0xff] %vm3150_vm3, %v3030_v23  ;;  %vm2521_vm11 = vcmp.ge.f32.partialorder %v1915_v19, 0.0  ;;  %v2777_v32 = vmul.f32 0.2, %v1915_v19  ;;  %vm2391_vm12 = vcmp.ge.f32.partialorder %v1395_v24, 0.0  ;;  %v1416_v37 = vadd.f32 %v3818_v26, %v4666_v52  ;;  %v1407_v39 = vpop.f32.mrb[13].mxu0 }
  0xf7   :  { %v2647_v33 = vmul.f32 0.2, %v1395_v24  ;;  %vm2519_vm13 = vcmp.ge.f32.partialorder %v1907_v25, 0.0  ;;  %v2775_v34 = vmul.f32 0.2, %v1907_v25  ;;  %v2905_v35 = vsel %vm2393_vm10, %v1403_v18, %v2649_v31  ;;  %v1919_v40 = vpop.f32.mrb[13].mxu1 }
  0xf8   :  { %v3033_v36 = vsel %vm2521_vm11, %v1915_v19, %v2777_v32  ;;  %v1928_v38 = vadd.f32 %v3946_v27, %v4666_v52  ;;  %3162 = vst.msk [vmem:[%s6038_s3 + $0x58] sm:$0xff] %vm3150_vm3, %v2905_v35  ;;  %v1408_v44 = vadd.f32 %v4666_v52, %v1407_v39  ;;  %v1920_v45 = vadd.f32 %v4666_v52, %v1919_v40  ;;  %v3819_v46 = vpop.f32.mrb[14].mxu0  ;;  %v3947_v47 = vpop.f32.mrb[14].mxu1 }
  0xf9   :  { %3290 = vst.msk [vmem:[%s6038_s3 + $0x458] sm:$0xff] %vm3150_vm3, %v3033_v36  ;;  %v2903_v42 = vsel %vm2391_vm12, %v1395_v24, %v2647_v33  ;;  %v3031_v43 = vsel %vm2519_vm13, %v1907_v25, %v2775_v34  ;;  %vm2396_vm14 = vcmp.ge.f32.partialorder %v1416_v37, 0.0  ;;  %v2652_v48 = vmul.f32 0.2, %v1416_v37  ;;  %v1410_v57 = vpop.f32.mrb[15].mxu0  ;;  %v1922_v58 = vpop.f32.mrb[15].mxu1 }
  0xfa   :  { %3160 = vst.msk [vmem:[%s6038_s3 + $0x48] sm:$0xff] %vm3150_vm3, %v2903_v42  ;;  %3288 = vst.msk [vmem:[%s6038_s3 + $0x448] sm:$0xff] %vm3150_vm3, %v3031_v43  ;;  %vm2524_vm15 = vcmp.ge.f32.partialorder %v1928_v38, 0.0  ;;  %v2780_v49 = vmul.f32 0.2, %v1928_v38  ;;  %3925 = vmatmul.mubr.msk.bf16.gmra.mrb[120].mxu0 %vm933_vm2, %v4189_v28  ;;  %vm2394_vm0 = vcmp.ge.f32.partialorder %v1408_v44, 0.0  ;;  %v1419_v55 = vadd.f32 %v3819_v46, %v4666_v52 }
  0xfb   :  { %v2650_v50 = vmul.f32 0.2, %v1408_v44  ;;  %vm2522_vm1 = vcmp.ge.f32.partialorder %v1920_v45, 0.0  ;;  %v2778_v51 = vmul.f32 0.2, %v1920_v45  ;;  %4053 = vmatmul.mubr.msk.bf16.gmra.mrb[120].mxu1 %vm933_vm2, %v4190_v29  ;;  %3928 = vmatprep.mubr.msk.bf16.mxu0 %vm933_vm2, %v4191_v30  ;;  %v2908_v53 = vsel %vm2396_vm14, %v1416_v37, %v2652_v48 }
  0xfc   :  { %v3036_v54 = vsel %vm2524_vm15, %v1928_v38, %v2780_v49  ;;  %v1931_v56 = vadd.f32 %v3947_v47, %v4666_v52  ;;  %4056 = vmatprep.mubr.msk.bf16.mxu1 %vm933_vm2, %v4192_v41  ;;  %3165 = vst.msk [vmem:[%s6038_s3 + $0x70] sm:$0xff] %vm3150_vm3, %v2908_v53  ;;  %v1411_v61 = vadd.f32 %v4666_v52, %v1410_v57  ;;  %vm2397_vm4 = vcmp.ge.f32.partialorder %v1419_v55, 0.0 }
  0xfd   :  { %3293 = vst.msk [vmem:[%s6038_s3 + $0x470] sm:$0xff] %vm3150_vm3, %v3036_v54  ;;  %v2906_v59 = vsel %vm2394_vm0, %v1408_v44, %v2650_v50  ;;  %v3034_v60 = vsel %vm2522_vm1, %v1920_v45, %v2778_v51  ;;  %v1923_v62 = vadd.f32 %v4666_v52, %v1922_v58  ;;  %v3822_v63 = vpop.f32.mrb[16].mxu0  ;;  %v3950_v0 = vpop.f32.mrb[16].mxu1  ;;  %v2653_v3 = vmul.f32 0.2, %v1419_v55 }
  0xfe   :  { %3163 = vst.msk [vmem:[%s6038_s3 + $0x60] sm:$0xff] %vm3150_vm3, %v2906_v59  ;;  %3291 = vst.msk [vmem:[%s6038_s3 + $0x460] sm:$0xff] %vm3150_vm3, %v3034_v60  ;;  %vm2525_vm5 = vcmp.ge.f32.partialorder %v1931_v56, 0.0  ;;  %v2781_v4 = vmul.f32 0.2, %v1931_v56  ;;  %vm2395_vm6 = vcmp.ge.f32.partialorder %v1411_v61, 0.0  ;;  %v1432_v9 = vadd.f32 %v3822_v63, %v4666_v52 }
  0xff   :  { %v2651_v5 = vmul.f32 0.2, %v1411_v61  ;;  %vm2523_vm7 = vcmp.ge.f32.partialorder %v1923_v62, 0.0  ;;  %v2779_v6 = vmul.f32 0.2, %v1923_v62  ;;  %v2909_v7 = vsel %vm2397_vm4, %v1419_v55, %v2653_v3  ;;  %v1423_v11 = vpop.f32.mrb[17].mxu0 }
 0x100   :  { %v3037_v8 = vsel %vm2525_vm5, %v1931_v56, %v2781_v4  ;;  %v1944_v10 = vadd.f32 %v3950_v0, %v4666_v52  ;;  %v1935_v12 = vpop.f32.mrb[17].mxu1  ;;  %3166 = vst.msk [vmem:[%s6038_s3 + $0x78] sm:$0xff] %vm3150_vm3, %v2909_v7  ;;  %v1424_v15 = vadd.f32 %v4666_v52, %v1423_v11  ;;  %v3823_v17 = vpop.f32.mrb[18].mxu0  ;;  %vm2400_vm8 = vcmp.ge.f32.partialorder %v1432_v9, 0.0 }
 0x101   :  { %3294 = vst.msk [vmem:[%s6038_s3 + $0x478] sm:$0xff] %vm3150_vm3, %v3037_v8  ;;  %v2907_v13 = vsel %vm2395_vm6, %v1411_v61, %v2651_v5  ;;  %v3035_v14 = vsel %vm2523_vm7, %v1923_v62, %v2779_v6  ;;  %v1936_v16 = vadd.f32 %v4666_v52, %v1935_v12  ;;  %v3951_v18 = vpop.f32.mrb[18].mxu1  ;;  %v2656_v19 = vmul.f32 0.2, %v1432_v9  ;;  %v1426_v27 = vpop.f32.mrb[19].mxu0 }
 0x102   :  { %3164 = vst.msk [vmem:[%s6038_s3 + $0x68] sm:$0xff] %vm3150_vm3, %v2907_v13  ;;  %3292 = vst.msk [vmem:[%s6038_s3 + $0x468] sm:$0xff] %vm3150_vm3, %v3035_v14  ;;  %vm2528_vm9 = vcmp.ge.f32.partialorder %v1944_v10, 0.0  ;;  %v2784_v20 = vmul.f32 0.2, %v1944_v10  ;;  %3929 = vmatmul.mubr.msk.bf16.gmra.mrb[124].mxu0 %vm933_vm2, %v4193_v1  ;;  %vm2398_vm10 = vcmp.ge.f32.partialorder %v1424_v15, 0.0  ;;  %v1435_v25 = vadd.f32 %v3823_v17, %v4666_v52 }
 0x103   :  { %v2654_v21 = vmul.f32 0.2, %v1424_v15  ;;  %vm2526_vm11 = vcmp.ge.f32.partialorder %v1936_v16, 0.0  ;;  %v2782_v22 = vmul.f32 0.2, %v1936_v16  ;;  %4057 = vmatmul.mubr.msk.bf16.gmra.mrb[124].mxu1 %vm933_vm2, %v4194_v2  ;;  %v2912_v23 = vsel %vm2400_vm8, %v1432_v9, %v2656_v19  ;;  %v1938_v28 = vpop.f32.mrb[19].mxu1 }
 0x104   :  { %v3040_v24 = vsel %vm2528_vm9, %v1944_v10, %v2784_v20  ;;  %v1947_v26 = vadd.f32 %v3951_v18, %v4666_v52  ;;  %3169 = vst.msk [vmem:[%s6038_s3 + $0x90] sm:$0xff] %vm3150_vm3, %v2912_v23  ;;  %v1427_v31 = vadd.f32 %v4666_v52, %v1426_v27  ;;  %v1939_v32 = vadd.f32 %v4666_v52, %v1938_v28 }
 0x105   :  { %3297 = vst.msk [vmem:[%s6038_s3 + $0x490] sm:$0xff] %vm3150_vm3, %v3040_v24  ;;  %v2910_v29 = vsel %vm2398_vm10, %v1424_v15, %v2654_v21  ;;  %v3038_v30 = vsel %vm2526_vm11, %v1936_v16, %v2782_v22  ;;  %v3826_v33 = vpop.f32.mrb[20].mxu0  ;;  %v3954_v34 = vpop.f32.mrb[20].mxu1  ;;  %vm2401_vm2 = vcmp.ge.f32.partialorder %v1435_v25, 0.0  ;;  %v2657_v35 = vmul.f32 0.2, %v1435_v25 }
 0x106   :  { %3167 = vst.msk [vmem:[%s6038_s3 + $0x80] sm:$0xff] %vm3150_vm3, %v2910_v29  ;;  %3295 = vst.msk [vmem:[%s6038_s3 + $0x480] sm:$0xff] %vm3150_vm3, %v3038_v30  ;;  %vm2529_vm12 = vcmp.ge.f32.partialorder %v1947_v26, 0.0  ;;  %v2785_v36 = vmul.f32 0.2, %v1947_v26  ;;  %vm2399_vm13 = vcmp.ge.f32.partialorder %v1427_v31, 0.0  ;;  %v1448_v41 = vadd.f32 %v3826_v33, %v4666_v52 }
 0x107   :  { %v2655_v37 = vmul.f32 0.2, %v1427_v31  ;;  %vm2527_vm14 = vcmp.ge.f32.partialorder %v1939_v32, 0.0  ;;  %v2783_v38 = vmul.f32 0.2, %v1939_v32  ;;  %v2913_v39 = vsel %vm2401_vm2, %v1435_v25, %v2657_v35  ;;  %v1439_v43 = vpop.f32.mrb[21].mxu0 }
 0x108   :  { %v3041_v40 = vsel %vm2529_vm12, %v1947_v26, %v2785_v36  ;;  %v1960_v42 = vadd.f32 %v3954_v34, %v4666_v52  ;;  %v1951_v44 = vpop.f32.mrb[21].mxu1  ;;  %3170 = vst.msk [vmem:[%s6038_s3 + $0x98] sm:$0xff] %vm3150_vm3, %v2913_v39  ;;  %v1440_v47 = vadd.f32 %v4666_v52, %v1439_v43  ;;  %v3827_v49 = vpop.f32.mrb[22].mxu0  ;;  %vm2404_vm15 = vcmp.ge.f32.partialorder %v1448_v41, 0.0 }
 0x109   :  { %3298 = vst.msk [vmem:[%s6038_s3 + $0x498] sm:$0xff] %vm3150_vm3, %v3041_v40  ;;  %v2911_v45 = vsel %vm2399_vm13, %v1427_v31, %v2655_v37  ;;  %v3039_v46 = vsel %vm2527_vm14, %v1939_v32, %v2783_v38  ;;  %v1952_v48 = vadd.f32 %v4666_v52, %v1951_v44  ;;  %v3955_v50 = vpop.f32.mrb[22].mxu1  ;;  %v2660_v51 = vmul.f32 0.2, %v1448_v41  ;;  %v1442_v60 = vpop.f32.mrb[23].mxu0 }
 0x10a   :  { %3168 = vst.msk [vmem:[%s6038_s3 + $0x88] sm:$0xff] %vm3150_vm3, %v2911_v45  ;;  %3296 = vst.msk [vmem:[%s6038_s3 + $0x488] sm:$0xff] %vm3150_vm3, %v3039_v46  ;;  %vm2532_vm0 = vcmp.ge.f32.partialorder %v1960_v42, 0.0  ;;  %v2788_v53 = vmul.f32 0.2, %v1960_v42  ;;  %vm2402_vm1 = vcmp.ge.f32.partialorder %v1440_v47, 0.0  ;;  %v1451_v58 = vadd.f32 %v3827_v49, %v4666_v52 }
 0x10b   :  { %v2658_v54 = vmul.f32 0.2, %v1440_v47  ;;  %vm2530_vm4 = vcmp.ge.f32.partialorder %v1952_v48, 0.0  ;;  %v2786_v55 = vmul.f32 0.2, %v1952_v48  ;;  %v2916_v56 = vsel %vm2404_vm15, %v1448_v41, %v2660_v51  ;;  %v1954_v61 = vpop.f32.mrb[23].mxu1 }
 0x10c   :  { %v3044_v57 = vsel %vm2532_vm0, %v1960_v42, %v2788_v53  ;;  %v1963_v59 = vadd.f32 %v3955_v50, %v4666_v52  ;;  %3173 = vst.msk [vmem:[%s6038_s3 + $0xb0] sm:$0xff] %vm3150_vm3, %v2916_v56  ;;  %v1443_v0 = vadd.f32 %v4666_v52, %v1442_v60  ;;  %v1955_v1 = vadd.f32 %v4666_v52, %v1954_v61 }
 0x10d   :  { %3301 = vst.msk [vmem:[%s6038_s3 + $0x4b0] sm:$0xff] %vm3150_vm3, %v3044_v57  ;;  %v2914_v62 = vsel %vm2402_vm1, %v1440_v47, %v2658_v54  ;;  %v3042_v63 = vsel %vm2530_vm4, %v1952_v48, %v2786_v55  ;;  %v3830_v2 = vpop.f32.mrb[24].mxu0  ;;  %v3958_v3 = vpop.f32.mrb[24].mxu1  ;;  %vm2405_vm5 = vcmp.ge.f32.partialorder %v1451_v58, 0.0  ;;  %v2661_v4 = vmul.f32 0.2, %v1451_v58 }
 0x10e   :  { %3171 = vst.msk [vmem:[%s6038_s3 + $0xa0] sm:$0xff] %vm3150_vm3, %v2914_v62  ;;  %3299 = vst.msk [vmem:[%s6038_s3 + $0x4a0] sm:$0xff] %vm3150_vm3, %v3042_v63  ;;  %vm2533_vm6 = vcmp.ge.f32.partialorder %v1963_v59, 0.0  ;;  %v2789_v5 = vmul.f32 0.2, %v1963_v59  ;;  %vm2403_vm7 = vcmp.ge.f32.partialorder %v1443_v0, 0.0  ;;  %v1464_v10 = vadd.f32 %v3830_v2, %v4666_v52 }
 0x10f   :  { %v2659_v6 = vmul.f32 0.2, %v1443_v0  ;;  %vm2531_vm8 = vcmp.ge.f32.partialorder %v1955_v1, 0.0  ;;  %v2787_v7 = vmul.f32 0.2, %v1955_v1  ;;  %v2917_v8 = vsel %vm2405_vm5, %v1451_v58, %v2661_v4  ;;  %v1455_v12 = vpop.f32.mrb[25].mxu0 }
 0x110   :  { %v3045_v9 = vsel %vm2533_vm6, %v1963_v59, %v2789_v5  ;;  %v1976_v11 = vadd.f32 %v3958_v3, %v4666_v52  ;;  %v1967_v13 = vpop.f32.mrb[25].mxu1  ;;  %3174 = vst.msk [vmem:[%s6038_s3 + $0xb8] sm:$0xff] %vm3150_vm3, %v2917_v8  ;;  %v1456_v16 = vadd.f32 %v4666_v52, %v1455_v12  ;;  %v3831_v18 = vpop.f32.mrb[26].mxu0  ;;  %vm2408_vm9 = vcmp.ge.f32.partialorder %v1464_v10, 0.0 }
 0x111   :  { %3302 = vst.msk [vmem:[%s6038_s3 + $0x4b8] sm:$0xff] %vm3150_vm3, %v3045_v9  ;;  %v2915_v14 = vsel %vm2403_vm7, %v1443_v0, %v2659_v6  ;;  %v3043_v15 = vsel %vm2531_vm8, %v1955_v1, %v2787_v7  ;;  %v1968_v17 = vadd.f32 %v4666_v52, %v1967_v13  ;;  %v3959_v19 = vpop.f32.mrb[26].mxu1  ;;  %v2664_v20 = vmul.f32 0.2, %v1464_v10  ;;  %v1458_v28 = vpop.f32.mrb[27].mxu0 }
 0x112   :  { %3172 = vst.msk [vmem:[%s6038_s3 + $0xa8] sm:$0xff] %vm3150_vm3, %v2915_v14  ;;  %3300 = vst.msk [vmem:[%s6038_s3 + $0x4a8] sm:$0xff] %vm3150_vm3, %v3043_v15  ;;  %vm2536_vm10 = vcmp.ge.f32.partialorder %v1976_v11, 0.0  ;;  %v2792_v21 = vmul.f32 0.2, %v1976_v11  ;;  %vm2406_vm11 = vcmp.ge.f32.partialorder %v1456_v16, 0.0  ;;  %v1467_v26 = vadd.f32 %v3831_v18, %v4666_v52 }
 0x113   :  { %v2662_v22 = vmul.f32 0.2, %v1456_v16  ;;  %vm2534_vm2 = vcmp.ge.f32.partialorder %v1968_v17, 0.0  ;;  %v2790_v23 = vmul.f32 0.2, %v1968_v17  ;;  %v2920_v24 = vsel %vm2408_vm9, %v1464_v10, %v2664_v20  ;;  %v1970_v29 = vpop.f32.mrb[27].mxu1 }
 0x114   :  { %v3048_v25 = vsel %vm2536_vm10, %v1976_v11, %v2792_v21  ;;  %v1979_v27 = vadd.f32 %v3959_v19, %v4666_v52  ;;  %3177 = vst.msk [vmem:[%s6038_s3 + $0xd0] sm:$0xff] %vm3150_vm3, %v2920_v24  ;;  %v1459_v32 = vadd.f32 %v4666_v52, %v1458_v28  ;;  %v1971_v33 = vadd.f32 %v4666_v52, %v1970_v29 }
 0x115   :  { %3305 = vst.msk [vmem:[%s6038_s3 + $0x4d0] sm:$0xff] %vm3150_vm3, %v3048_v25  ;;  %v2918_v30 = vsel %vm2406_vm11, %v1456_v16, %v2662_v22  ;;  %v3046_v31 = vsel %vm2534_vm2, %v1968_v17, %v2790_v23  ;;  %v3834_v34 = vpop.f32.mrb[28].mxu0  ;;  %v3962_v35 = vpop.f32.mrb[28].mxu1  ;;  %vm2409_vm12 = vcmp.ge.f32.partialorder %v1467_v26, 0.0  ;;  %v2665_v36 = vmul.f32 0.2, %v1467_v26 }
 0x116   :  { %3175 = vst.msk [vmem:[%s6038_s3 + $0xc0] sm:$0xff] %vm3150_vm3, %v2918_v30  ;;  %3303 = vst.msk [vmem:[%s6038_s3 + $0x4c0] sm:$0xff] %vm3150_vm3, %v3046_v31  ;;  %vm2537_vm13 = vcmp.ge.f32.partialorder %v1979_v27, 0.0  ;;  %v2793_v37 = vmul.f32 0.2, %v1979_v27  ;;  %vm2407_vm14 = vcmp.ge.f32.partialorder %v1459_v32, 0.0  ;;  %v1480_v42 = vadd.f32 %v3834_v34, %v4666_v52 }
 0x117   :  { %v2663_v38 = vmul.f32 0.2, %v1459_v32  ;;  %vm2535_vm15 = vcmp.ge.f32.partialorder %v1971_v33, 0.0  ;;  %v2791_v39 = vmul.f32 0.2, %v1971_v33  ;;  %v2921_v40 = vsel %vm2409_vm12, %v1467_v26, %v2665_v36  ;;  %v1471_v44 = vpop.f32.mrb[29].mxu0 }
 0x118   :  { %v3049_v41 = vsel %vm2537_vm13, %v1979_v27, %v2793_v37  ;;  %v1992_v43 = vadd.f32 %v3962_v35, %v4666_v52  ;;  %v1983_v45 = vpop.f32.mrb[29].mxu1  ;;  %3178 = vst.msk [vmem:[%s6038_s3 + $0xd8] sm:$0xff] %vm3150_vm3, %v2921_v40  ;;  %v1472_v48 = vadd.f32 %v4666_v52, %v1471_v44  ;;  %v3835_v50 = vpop.f32.mrb[30].mxu0  ;;  %vm2412_vm0 = vcmp.ge.f32.partialorder %v1480_v42, 0.0 }
 0x119   :  { %3306 = vst.msk [vmem:[%s6038_s3 + $0x4d8] sm:$0xff] %vm3150_vm3, %v3049_v41  ;;  %v2919_v46 = vsel %vm2407_vm14, %v1459_v32, %v2663_v38  ;;  %v3047_v47 = vsel %vm2535_vm15, %v1971_v33, %v2791_v39  ;;  %v1984_v49 = vadd.f32 %v4666_v52, %v1983_v45  ;;  %v3963_v51 = vpop.f32.mrb[30].mxu1  ;;  %v2668_v53 = vmul.f32 0.2, %v1480_v42  ;;  %v1474_v61 = vpop.f32.mrb[31].mxu0 }
 0x11a   :  { %3176 = vst.msk [vmem:[%s6038_s3 + $0xc8] sm:$0xff] %vm3150_vm3, %v2919_v46  ;;  %3304 = vst.msk [vmem:[%s6038_s3 + $0x4c8] sm:$0xff] %vm3150_vm3, %v3047_v47  ;;  %vm2540_vm1 = vcmp.ge.f32.partialorder %v1992_v43, 0.0  ;;  %v2796_v54 = vmul.f32 0.2, %v1992_v43  ;;  %vm2410_vm4 = vcmp.ge.f32.partialorder %v1472_v48, 0.0  ;;  %v1483_v59 = vadd.f32 %v3835_v50, %v4666_v52 }
 0x11b   :  { %v2666_v55 = vmul.f32 0.2, %v1472_v48  ;;  %vm2538_vm5 = vcmp.ge.f32.partialorder %v1984_v49, 0.0  ;;  %v2794_v56 = vmul.f32 0.2, %v1984_v49  ;;  %v2924_v57 = vsel %vm2412_vm0, %v1480_v42, %v2668_v53  ;;  %v1986_v62 = vpop.f32.mrb[31].mxu1 }
 0x11c   :  { %v3052_v58 = vsel %vm2540_vm1, %v1992_v43, %v2796_v54  ;;  %v1995_v60 = vadd.f32 %v3963_v51, %v4666_v52  ;;  %3181 = vst.msk [vmem:[%s6038_s3 + $0xf0] sm:$0xff] %vm3150_vm3, %v2924_v57  ;;  %v1475_v1 = vadd.f32 %v4666_v52, %v1474_v61  ;;  %v1987_v2 = vadd.f32 %v4666_v52, %v1986_v62 }
 0x11d   :  { %3309 = vst.msk [vmem:[%s6038_s3 + $0x4f0] sm:$0xff] %vm3150_vm3, %v3052_v58  ;;  %v2922_v63 = vsel %vm2410_vm4, %v1472_v48, %v2666_v55  ;;  %v3050_v0 = vsel %vm2538_vm5, %v1984_v49, %v2794_v56  ;;  %v3838_v3 = vpop.f32.mrb[32].mxu0  ;;  %v3966_v4 = vpop.f32.mrb[32].mxu1  ;;  %vm2413_vm6 = vcmp.ge.f32.partialorder %v1483_v59, 0.0  ;;  %v2669_v5 = vmul.f32 0.2, %v1483_v59 }
 0x11e   :  { %3179 = vst.msk [vmem:[%s6038_s3 + $0xe0] sm:$0xff] %vm3150_vm3, %v2922_v63  ;;  %3307 = vst.msk [vmem:[%s6038_s3 + $0x4e0] sm:$0xff] %vm3150_vm3, %v3050_v0  ;;  %vm2541_vm7 = vcmp.ge.f32.partialorder %v1995_v60, 0.0  ;;  %v2797_v6 = vmul.f32 0.2, %v1995_v60  ;;  %vm2411_vm8 = vcmp.ge.f32.partialorder %v1475_v1, 0.0  ;;  %v1496_v11 = vadd.f32 %v3838_v3, %v4666_v52 }
 0x11f   :  { %v2667_v7 = vmul.f32 0.2, %v1475_v1  ;;  %vm2539_vm9 = vcmp.ge.f32.partialorder %v1987_v2, 0.0  ;;  %v2795_v8 = vmul.f32 0.2, %v1987_v2  ;;  %v2925_v9 = vsel %vm2413_vm6, %v1483_v59, %v2669_v5  ;;  %v1487_v13 = vpop.f32.mrb[33].mxu0 }
 0x120   :  { %v3053_v10 = vsel %vm2541_vm7, %v1995_v60, %v2797_v6  ;;  %v2008_v12 = vadd.f32 %v3966_v4, %v4666_v52  ;;  %v1999_v14 = vpop.f32.mrb[33].mxu1  ;;  %3182 = vst.msk [vmem:[%s6038_s3 + $0xf8] sm:$0xff] %vm3150_vm3, %v2925_v9  ;;  %v1488_v17 = vadd.f32 %v4666_v52, %v1487_v13  ;;  %v3839_v19 = vpop.f32.mrb[34].mxu0  ;;  %vm2416_vm10 = vcmp.ge.f32.partialorder %v1496_v11, 0.0 }
 0x121   :  { %3310 = vst.msk [vmem:[%s6038_s3 + $0x4f8] sm:$0xff] %vm3150_vm3, %v3053_v10  ;;  %v2923_v15 = vsel %vm2411_vm8, %v1475_v1, %v2667_v7  ;;  %v3051_v16 = vsel %vm2539_vm9, %v1987_v2, %v2795_v8  ;;  %v2000_v18 = vadd.f32 %v4666_v52, %v1999_v14  ;;  %v3967_v20 = vpop.f32.mrb[34].mxu1  ;;  %v2672_v21 = vmul.f32 0.2, %v1496_v11  ;;  %v1490_v29 = vpop.f32.mrb[35].mxu0 }
 0x122   :  { %3180 = vst.msk [vmem:[%s6038_s3 + $0xe8] sm:$0xff] %vm3150_vm3, %v2923_v15  ;;  %3308 = vst.msk [vmem:[%s6038_s3 + $0x4e8] sm:$0xff] %vm3150_vm3, %v3051_v16  ;;  %vm2544_vm11 = vcmp.ge.f32.partialorder %v2008_v12, 0.0  ;;  %v2800_v22 = vmul.f32 0.2, %v2008_v12  ;;  %vm2414_vm2 = vcmp.ge.f32.partialorder %v1488_v17, 0.0  ;;  %v1499_v27 = vadd.f32 %v3839_v19, %v4666_v52 }
 0x123   :  { %v2670_v23 = vmul.f32 0.2, %v1488_v17  ;;  %vm2542_vm12 = vcmp.ge.f32.partialorder %v2000_v18, 0.0  ;;  %v2798_v24 = vmul.f32 0.2, %v2000_v18  ;;  %v2928_v25 = vsel %vm2416_vm10, %v1496_v11, %v2672_v21  ;;  %v2002_v30 = vpop.f32.mrb[35].mxu1 }
 0x124   :  { %v3056_v26 = vsel %vm2544_vm11, %v2008_v12, %v2800_v22  ;;  %v2011_v28 = vadd.f32 %v3967_v20, %v4666_v52  ;;  %3185 = vst.msk [vmem:[%s6038_s3 + $0x110] sm:$0xff] %vm3150_vm3, %v2928_v25  ;;  %v1491_v33 = vadd.f32 %v4666_v52, %v1490_v29  ;;  %v2003_v34 = vadd.f32 %v4666_v52, %v2002_v30  ;;  %v5129_v11 = vld [vmem:[%s6037_s2] ss:$0 sm:$0xff] }
 0x125   :  { %3313 = vst.msk [vmem:[%s6038_s3 + $0x510] sm:$0xff] %vm3150_vm3, %v3056_v26  ;;  %v2926_v31 = vsel %vm2414_vm2, %v1488_v17, %v2670_v23  ;;  %v3054_v32 = vsel %vm2542_vm12, %v2000_v18, %v2798_v24  ;;  %v3842_v35 = vpop.f32.mrb[36].mxu0  ;;  %v3970_v36 = vpop.f32.mrb[36].mxu1  ;;  %vm2417_vm13 = vcmp.ge.f32.partialorder %v1499_v27, 0.0  ;;  %v2673_v37 = vmul.f32 0.2, %v1499_v27 }
 0x126   :  { %3183 = vst.msk [vmem:[%s6038_s3 + $0x100] sm:$0xff] %vm3150_vm3, %v2926_v31  ;;  %3311 = vst.msk [vmem:[%s6038_s3 + $0x500] sm:$0xff] %vm3150_vm3, %v3054_v32  ;;  %vm2545_vm14 = vcmp.ge.f32.partialorder %v2011_v28, 0.0  ;;  %v2801_v38 = vmul.f32 0.2, %v2011_v28  ;;  %vm2415_vm15 = vcmp.ge.f32.partialorder %v1491_v33, 0.0  ;;  %v1512_v43 = vadd.f32 %v3842_v35, %v4666_v52 }
 0x127   :  { %v2671_v39 = vmul.f32 0.2, %v1491_v33  ;;  %vm2543_vm0 = vcmp.ge.f32.partialorder %v2003_v34, 0.0  ;;  %v2799_v40 = vmul.f32 0.2, %v2003_v34  ;;  %v2929_v41 = vsel %vm2417_vm13, %v1499_v27, %v2673_v37  ;;  %v1503_v45 = vpop.f32.mrb[37].mxu0 }
 0x128   :  { %v3057_v42 = vsel %vm2545_vm14, %v2011_v28, %v2801_v38  ;;  %v2024_v44 = vadd.f32 %v3970_v36, %v4666_v52  ;;  %v2015_v46 = vpop.f32.mrb[37].mxu1  ;;  %3186 = vst.msk [vmem:[%s6038_s3 + $0x118] sm:$0xff] %vm3150_vm3, %v2929_v41  ;;  %v1504_v49 = vadd.f32 %v4666_v52, %v1503_v45  ;;  %v3843_v51 = vpop.f32.mrb[38].mxu0  ;;  %vm2420_vm1 = vcmp.ge.f32.partialorder %v1512_v43, 0.0 }
 0x129   :  { %3314 = vst.msk [vmem:[%s6038_s3 + $0x518] sm:$0xff] %vm3150_vm3, %v3057_v42  ;;  %v2927_v47 = vsel %vm2415_vm15, %v1491_v33, %v2671_v39  ;;  %v3055_v48 = vsel %vm2543_vm0, %v2003_v34, %v2799_v40  ;;  %v2016_v50 = vadd.f32 %v4666_v52, %v2015_v46  ;;  %v3971_v53 = vpop.f32.mrb[38].mxu1  ;;  %v2676_v54 = vmul.f32 0.2, %v1512_v43  ;;  %v1506_v62 = vpop.f32.mrb[39].mxu0 }
 0x12a   :  { %3184 = vst.msk [vmem:[%s6038_s3 + $0x108] sm:$0xff] %vm3150_vm3, %v2927_v47  ;;  %3312 = vst.msk [vmem:[%s6038_s3 + $0x508] sm:$0xff] %vm3150_vm3, %v3055_v48  ;;  %vm2548_vm4 = vcmp.ge.f32.partialorder %v2024_v44, 0.0  ;;  %v2804_v55 = vmul.f32 0.2, %v2024_v44  ;;  %vm2418_vm5 = vcmp.ge.f32.partialorder %v1504_v49, 0.0  ;;  %v1515_v60 = vadd.f32 %v3843_v51, %v4666_v52 }
 0x12b   :  { %v2674_v56 = vmul.f32 0.2, %v1504_v49  ;;  %vm2546_vm6 = vcmp.ge.f32.partialorder %v2016_v50, 0.0  ;;  %v2802_v57 = vmul.f32 0.2, %v2016_v50  ;;  %v2932_v58 = vsel %vm2420_vm1, %v1512_v43, %v2676_v54  ;;  %v2018_v63 = vpop.f32.mrb[39].mxu1 }
 0x12c   :  { %v3060_v59 = vsel %vm2548_vm4, %v2024_v44, %v2804_v55  ;;  %v2027_v61 = vadd.f32 %v3971_v53, %v4666_v52  ;;  %3189 = vst.msk [vmem:[%s6038_s3 + $0x130] sm:$0xff] %vm3150_vm3, %v2932_v58  ;;  %v1507_v2 = vadd.f32 %v4666_v52, %v1506_v62  ;;  %v2019_v3 = vadd.f32 %v4666_v52, %v2018_v63 }
 0x12d   :  { %3317 = vst.msk [vmem:[%s6038_s3 + $0x530] sm:$0xff] %vm3150_vm3, %v3060_v59  ;;  %v2930_v0 = vsel %vm2418_vm5, %v1504_v49, %v2674_v56  ;;  %v3058_v1 = vsel %vm2546_vm6, %v2016_v50, %v2802_v57  ;;  %v3846_v4 = vpop.f32.mrb[40].mxu0  ;;  %v3974_v5 = vpop.f32.mrb[40].mxu1  ;;  %vm2421_vm7 = vcmp.ge.f32.partialorder %v1515_v60, 0.0  ;;  %v2677_v6 = vmul.f32 0.2, %v1515_v60 }
 0x12e   :  { %3187 = vst.msk [vmem:[%s6038_s3 + $0x120] sm:$0xff] %vm3150_vm3, %v2930_v0  ;;  %3315 = vst.msk [vmem:[%s6038_s3 + $0x520] sm:$0xff] %vm3150_vm3, %v3058_v1  ;;  %vm2549_vm8 = vcmp.ge.f32.partialorder %v2027_v61, 0.0  ;;  %v2805_v7 = vmul.f32 0.2, %v2027_v61  ;;  %vm2419_vm9 = vcmp.ge.f32.partialorder %v1507_v2, 0.0  ;;  %v1528_v12 = vadd.f32 %v5129_v11, %v3846_v4 }
 0x12f   :  { %v2675_v8 = vmul.f32 0.2, %v1507_v2  ;;  %vm2547_vm10 = vcmp.ge.f32.partialorder %v2019_v3, 0.0  ;;  %v2803_v52 = vmul.f32 0.2, %v2019_v3  ;;  %v2933_v9 = vsel %vm2421_vm7, %v1515_v60, %v2677_v6  ;;  %v1519_v14 = vpop.f32.mrb[41].mxu0 }
 0x130   :  { %v3061_v10 = vsel %vm2549_vm8, %v2027_v61, %v2805_v7  ;;  %v2040_v13 = vadd.f32 %v5129_v11, %v3974_v5  ;;  %v2031_v15 = vpop.f32.mrb[41].mxu1  ;;  %3190 = vst.msk [vmem:[%s6038_s3 + $0x138] sm:$0xff] %vm3150_vm3, %v2933_v9  ;;  %v1520_v18 = vadd.f32 %v5129_v11, %v1519_v14  ;;  %v3847_v20 = vpop.f32.mrb[42].mxu0  ;;  %vm2424_vm11 = vcmp.ge.f32.partialorder %v1528_v12, 0.0 }
 0x131   :  { %3318 = vst.msk [vmem:[%s6038_s3 + $0x538] sm:$0xff] %vm3150_vm3, %v3061_v10  ;;  %v2931_v16 = vsel %vm2419_vm9, %v1507_v2, %v2675_v8  ;;  %v3059_v17 = vsel %vm2547_vm10, %v2019_v3, %v2803_v52  ;;  %v2032_v19 = vadd.f32 %v5129_v11, %v2031_v15  ;;  %v3975_v21 = vpop.f32.mrb[42].mxu1  ;;  %v2680_v22 = vmul.f32 0.2, %v1528_v12  ;;  %v1522_v30 = vpop.f32.mrb[43].mxu0 }
 0x132   :  { %3188 = vst.msk [vmem:[%s6038_s3 + $0x128] sm:$0xff] %vm3150_vm3, %v2931_v16  ;;  %3316 = vst.msk [vmem:[%s6038_s3 + $0x528] sm:$0xff] %vm3150_vm3, %v3059_v17  ;;  %vm2552_vm2 = vcmp.ge.f32.partialorder %v2040_v13, 0.0  ;;  %v2808_v23 = vmul.f32 0.2, %v2040_v13  ;;  %vm2422_vm12 = vcmp.ge.f32.partialorder %v1520_v18, 0.0  ;;  %v1531_v28 = vadd.f32 %v5129_v11, %v3847_v20 }
 0x133   :  { %v2678_v24 = vmul.f32 0.2, %v1520_v18  ;;  %vm2550_vm13 = vcmp.ge.f32.partialorder %v2032_v19, 0.0  ;;  %v2806_v25 = vmul.f32 0.2, %v2032_v19  ;;  %v2936_v26 = vsel %vm2424_vm11, %v1528_v12, %v2680_v22  ;;  %v2034_v31 = vpop.f32.mrb[43].mxu1 }
 0x134   :  { %v3064_v27 = vsel %vm2552_vm2, %v2040_v13, %v2808_v23  ;;  %v2043_v29 = vadd.f32 %v5129_v11, %v3975_v21  ;;  %3193 = vst.msk [vmem:[%s6038_s3 + $0x150] sm:$0xff] %vm3150_vm3, %v2936_v26  ;;  %v1523_v34 = vadd.f32 %v5129_v11, %v1522_v30  ;;  %v2035_v35 = vadd.f32 %v5129_v11, %v2034_v31 }
 0x135   :  { %3321 = vst.msk [vmem:[%s6038_s3 + $0x550] sm:$0xff] %vm3150_vm3, %v3064_v27  ;;  %v2934_v32 = vsel %vm2422_vm12, %v1520_v18, %v2678_v24  ;;  %v3062_v33 = vsel %vm2550_vm13, %v2032_v19, %v2806_v25  ;;  %v3850_v36 = vpop.f32.mrb[44].mxu0  ;;  %v3978_v37 = vpop.f32.mrb[44].mxu1  ;;  %vm2425_vm14 = vcmp.ge.f32.partialorder %v1531_v28, 0.0  ;;  %v2681_v38 = vmul.f32 0.2, %v1531_v28 }
 0x136   :  { %3191 = vst.msk [vmem:[%s6038_s3 + $0x140] sm:$0xff] %vm3150_vm3, %v2934_v32  ;;  %3319 = vst.msk [vmem:[%s6038_s3 + $0x540] sm:$0xff] %vm3150_vm3, %v3062_v33  ;;  %vm2553_vm15 = vcmp.ge.f32.partialorder %v2043_v29, 0.0  ;;  %v2809_v39 = vmul.f32 0.2, %v2043_v29  ;;  %vm2423_vm0 = vcmp.ge.f32.partialorder %v1523_v34, 0.0  ;;  %v1544_v44 = vadd.f32 %v5129_v11, %v3850_v36 }
 0x137   :  { %v2679_v40 = vmul.f32 0.2, %v1523_v34  ;;  %vm2551_vm1 = vcmp.ge.f32.partialorder %v2035_v35, 0.0  ;;  %v2807_v41 = vmul.f32 0.2, %v2035_v35  ;;  %v2937_v42 = vsel %vm2425_vm14, %v1531_v28, %v2681_v38  ;;  %v1535_v46 = vpop.f32.mrb[45].mxu0 }
 0x138   :  { %v3065_v43 = vsel %vm2553_vm15, %v2043_v29, %v2809_v39  ;;  %v2056_v45 = vadd.f32 %v5129_v11, %v3978_v37  ;;  %v2047_v47 = vpop.f32.mrb[45].mxu1  ;;  %3194 = vst.msk [vmem:[%s6038_s3 + $0x158] sm:$0xff] %vm3150_vm3, %v2937_v42  ;;  %v1536_v50 = vadd.f32 %v5129_v11, %v1535_v46  ;;  %v3851_v53 = vpop.f32.mrb[46].mxu0  ;;  %vm2428_vm4 = vcmp.ge.f32.partialorder %v1544_v44, 0.0 }
 0x139   :  { %3322 = vst.msk [vmem:[%s6038_s3 + $0x558] sm:$0xff] %vm3150_vm3, %v3065_v43  ;;  %v2935_v48 = vsel %vm2423_vm0, %v1523_v34, %v2679_v40  ;;  %v3063_v49 = vsel %vm2551_vm1, %v2035_v35, %v2807_v41  ;;  %v2048_v51 = vadd.f32 %v5129_v11, %v2047_v47  ;;  %v3979_v54 = vpop.f32.mrb[46].mxu1  ;;  %v2684_v55 = vmul.f32 0.2, %v1544_v44  ;;  %v1538_v63 = vpop.f32.mrb[47].mxu0 }
 0x13a   :  { %3192 = vst.msk [vmem:[%s6038_s3 + $0x148] sm:$0xff] %vm3150_vm3, %v2935_v48  ;;  %3320 = vst.msk [vmem:[%s6038_s3 + $0x548] sm:$0xff] %vm3150_vm3, %v3063_v49  ;;  %vm2556_vm5 = vcmp.ge.f32.partialorder %v2056_v45, 0.0  ;;  %v2812_v56 = vmul.f32 0.2, %v2056_v45  ;;  %vm2426_vm6 = vcmp.ge.f32.partialorder %v1536_v50, 0.0  ;;  %v1547_v61 = vadd.f32 %v5129_v11, %v3851_v53 }
 0x13b   :  { %v2682_v57 = vmul.f32 0.2, %v1536_v50  ;;  %vm2554_vm7 = vcmp.ge.f32.partialorder %v2048_v51, 0.0  ;;  %v2810_v58 = vmul.f32 0.2, %v2048_v51  ;;  %v2940_v59 = vsel %vm2428_vm4, %v1544_v44, %v2684_v55  ;;  %v2050_v0 = vpop.f32.mrb[47].mxu1 }
 0x13c   :  { %v3068_v60 = vsel %vm2556_vm5, %v2056_v45, %v2812_v56  ;;  %v2059_v62 = vadd.f32 %v5129_v11, %v3979_v54  ;;  %3197 = vst.msk [vmem:[%s6038_s3 + $0x170] sm:$0xff] %vm3150_vm3, %v2940_v59  ;;  %v1539_v3 = vadd.f32 %v5129_v11, %v1538_v63  ;;  %v2051_v4 = vadd.f32 %v5129_v11, %v2050_v0 }
 0x13d   :  { %3325 = vst.msk [vmem:[%s6038_s3 + $0x570] sm:$0xff] %vm3150_vm3, %v3068_v60  ;;  %v2938_v1 = vsel %vm2426_vm6, %v1536_v50, %v2682_v57  ;;  %v3066_v2 = vsel %vm2554_vm7, %v2048_v51, %v2810_v58  ;;  %v3854_v5 = vpop.f32.mrb[48].mxu0  ;;  %v3982_v6 = vpop.f32.mrb[48].mxu1  ;;  %vm2429_vm8 = vcmp.ge.f32.partialorder %v1547_v61, 0.0  ;;  %v2685_v7 = vmul.f32 0.2, %v1547_v61 }
 0x13e   :  { %3195 = vst.msk [vmem:[%s6038_s3 + $0x160] sm:$0xff] %vm3150_vm3, %v2938_v1  ;;  %3323 = vst.msk [vmem:[%s6038_s3 + $0x560] sm:$0xff] %vm3150_vm3, %v3066_v2  ;;  %vm2557_vm9 = vcmp.ge.f32.partialorder %v2059_v62, 0.0  ;;  %v2813_v8 = vmul.f32 0.2, %v2059_v62  ;;  %vm2427_vm10 = vcmp.ge.f32.partialorder %v1539_v3, 0.0  ;;  %v1560_v13 = vadd.f32 %v5129_v11, %v3854_v5 }
 0x13f   :  { %v2683_v52 = vmul.f32 0.2, %v1539_v3  ;;  %vm2555_vm11 = vcmp.ge.f32.partialorder %v2051_v4, 0.0  ;;  %v2811_v9 = vmul.f32 0.2, %v2051_v4  ;;  %v2941_v10 = vsel %vm2429_vm8, %v1547_v61, %v2685_v7  ;;  %v1551_v15 = vpop.f32.mrb[49].mxu0 }
 0x140   :  { %v3069_v12 = vsel %vm2557_vm9, %v2059_v62, %v2813_v8  ;;  %v2072_v14 = vadd.f32 %v5129_v11, %v3982_v6  ;;  %v2063_v16 = vpop.f32.mrb[49].mxu1  ;;  %3198 = vst.msk [vmem:[%s6038_s3 + $0x178] sm:$0xff] %vm3150_vm3, %v2941_v10  ;;  %v1552_v19 = vadd.f32 %v5129_v11, %v1551_v15  ;;  %v3855_v21 = vpop.f32.mrb[50].mxu0  ;;  %vm2432_vm2 = vcmp.ge.f32.partialorder %v1560_v13, 0.0 }
 0x141   :  { %3326 = vst.msk [vmem:[%s6038_s3 + $0x578] sm:$0xff] %vm3150_vm3, %v3069_v12  ;;  %v2939_v17 = vsel %vm2427_vm10, %v1539_v3, %v2683_v52  ;;  %v3067_v18 = vsel %vm2555_vm11, %v2051_v4, %v2811_v9  ;;  %v2064_v20 = vadd.f32 %v5129_v11, %v2063_v16  ;;  %v3983_v22 = vpop.f32.mrb[50].mxu1  ;;  %v2688_v23 = vmul.f32 0.2, %v1560_v13  ;;  %v1554_v31 = vpop.f32.mrb[51].mxu0 }
 0x142   :  { %3196 = vst.msk [vmem:[%s6038_s3 + $0x168] sm:$0xff] %vm3150_vm3, %v2939_v17  ;;  %3324 = vst.msk [vmem:[%s6038_s3 + $0x568] sm:$0xff] %vm3150_vm3, %v3067_v18  ;;  %vm2560_vm12 = vcmp.ge.f32.partialorder %v2072_v14, 0.0  ;;  %v2816_v24 = vmul.f32 0.2, %v2072_v14  ;;  %vm2430_vm13 = vcmp.ge.f32.partialorder %v1552_v19, 0.0  ;;  %v1563_v29 = vadd.f32 %v5129_v11, %v3855_v21 }
 0x143   :  { %v2686_v25 = vmul.f32 0.2, %v1552_v19  ;;  %vm2558_vm14 = vcmp.ge.f32.partialorder %v2064_v20, 0.0  ;;  %v2814_v26 = vmul.f32 0.2, %v2064_v20  ;;  %v2944_v27 = vsel %vm2432_vm2, %v1560_v13, %v2688_v23  ;;  %v2066_v32 = vpop.f32.mrb[51].mxu1 }
 0x144   :  { %v3072_v28 = vsel %vm2560_vm12, %v2072_v14, %v2816_v24  ;;  %v2075_v30 = vadd.f32 %v5129_v11, %v3983_v22  ;;  %3201 = vst.msk [vmem:[%s6038_s3 + $0x190] sm:$0xff] %vm3150_vm3, %v2944_v27  ;;  %v1555_v35 = vadd.f32 %v5129_v11, %v1554_v31  ;;  %v2067_v36 = vadd.f32 %v5129_v11, %v2066_v32 }
 0x145   :  { %3329 = vst.msk [vmem:[%s6038_s3 + $0x590] sm:$0xff] %vm3150_vm3, %v3072_v28  ;;  %v2942_v33 = vsel %vm2430_vm13, %v1552_v19, %v2686_v25  ;;  %v3070_v34 = vsel %vm2558_vm14, %v2064_v20, %v2814_v26  ;;  %v3858_v37 = vpop.f32.mrb[52].mxu0  ;;  %v3986_v38 = vpop.f32.mrb[52].mxu1  ;;  %vm2433_vm15 = vcmp.ge.f32.partialorder %v1563_v29, 0.0  ;;  %v2689_v39 = vmul.f32 0.2, %v1563_v29 }
 0x146   :  { %3199 = vst.msk [vmem:[%s6038_s3 + $0x180] sm:$0xff] %vm3150_vm3, %v2942_v33  ;;  %3327 = vst.msk [vmem:[%s6038_s3 + $0x580] sm:$0xff] %vm3150_vm3, %v3070_v34  ;;  %vm2561_vm0 = vcmp.ge.f32.partialorder %v2075_v30, 0.0  ;;  %v2817_v40 = vmul.f32 0.2, %v2075_v30  ;;  %vm2431_vm1 = vcmp.ge.f32.partialorder %v1555_v35, 0.0  ;;  %v1576_v45 = vadd.f32 %v5129_v11, %v3858_v37 }
 0x147   :  { %v2687_v41 = vmul.f32 0.2, %v1555_v35  ;;  %vm2559_vm4 = vcmp.ge.f32.partialorder %v2067_v36, 0.0  ;;  %v2815_v42 = vmul.f32 0.2, %v2067_v36  ;;  %v2945_v43 = vsel %vm2433_vm15, %v1563_v29, %v2689_v39  ;;  %v1567_v47 = vpop.f32.mrb[53].mxu0 }
 0x148   :  { %v3073_v44 = vsel %vm2561_vm0, %v2075_v30, %v2817_v40  ;;  %v2088_v46 = vadd.f32 %v5129_v11, %v3986_v38  ;;  %v2079_v48 = vpop.f32.mrb[53].mxu1  ;;  %3202 = vst.msk [vmem:[%s6038_s3 + $0x198] sm:$0xff] %vm3150_vm3, %v2945_v43  ;;  %v1568_v51 = vadd.f32 %v5129_v11, %v1567_v47  ;;  %v3859_v54 = vpop.f32.mrb[54].mxu0  ;;  %vm2436_vm5 = vcmp.ge.f32.partialorder %v1576_v45, 0.0 }
 0x149   :  { %3330 = vst.msk [vmem:[%s6038_s3 + $0x598] sm:$0xff] %vm3150_vm3, %v3073_v44  ;;  %v2943_v49 = vsel %vm2431_vm1, %v1555_v35, %v2687_v41  ;;  %v3071_v50 = vsel %vm2559_vm4, %v2067_v36, %v2815_v42  ;;  %v2080_v53 = vadd.f32 %v5129_v11, %v2079_v48  ;;  %v3987_v55 = vpop.f32.mrb[54].mxu1  ;;  %v2692_v56 = vmul.f32 0.2, %v1576_v45  ;;  %v1570_v0 = vpop.f32.mrb[55].mxu0 }
 0x14a   :  { %3200 = vst.msk [vmem:[%s6038_s3 + $0x188] sm:$0xff] %vm3150_vm3, %v2943_v49  ;;  %3328 = vst.msk [vmem:[%s6038_s3 + $0x588] sm:$0xff] %vm3150_vm3, %v3071_v50  ;;  %vm2564_vm6 = vcmp.ge.f32.partialorder %v2088_v46, 0.0  ;;  %v2820_v57 = vmul.f32 0.2, %v2088_v46  ;;  %vm2434_vm7 = vcmp.ge.f32.partialorder %v1568_v51, 0.0  ;;  %v1579_v62 = vadd.f32 %v5129_v11, %v3859_v54 }
 0x14b   :  { %v2690_v58 = vmul.f32 0.2, %v1568_v51  ;;  %vm2562_vm8 = vcmp.ge.f32.partialorder %v2080_v53, 0.0  ;;  %v2818_v59 = vmul.f32 0.2, %v2080_v53  ;;  %v2948_v60 = vsel %vm2436_vm5, %v1576_v45, %v2692_v56  ;;  %v2082_v1 = vpop.f32.mrb[55].mxu1 }
 0x14c   :  { %v3076_v61 = vsel %vm2564_vm6, %v2088_v46, %v2820_v57  ;;  %v2091_v63 = vadd.f32 %v5129_v11, %v3987_v55  ;;  %3205 = vst.msk [vmem:[%s6038_s3 + $0x1b0] sm:$0xff] %vm3150_vm3, %v2948_v60  ;;  %v1571_v4 = vadd.f32 %v5129_v11, %v1570_v0  ;;  %v2083_v5 = vadd.f32 %v5129_v11, %v2082_v1 }
 0x14d   :  { %3333 = vst.msk [vmem:[%s6038_s3 + $0x5b0] sm:$0xff] %vm3150_vm3, %v3076_v61  ;;  %v2946_v2 = vsel %vm2434_vm7, %v1568_v51, %v2690_v58  ;;  %v3074_v3 = vsel %vm2562_vm8, %v2080_v53, %v2818_v59  ;;  %v3862_v6 = vpop.f32.mrb[56].mxu0  ;;  %v3990_v7 = vpop.f32.mrb[56].mxu1  ;;  %vm2437_vm9 = vcmp.ge.f32.partialorder %v1579_v62, 0.0  ;;  %v2693_v8 = vmul.f32 0.2, %v1579_v62 }
 0x14e   :  { %3203 = vst.msk [vmem:[%s6038_s3 + $0x1a0] sm:$0xff] %vm3150_vm3, %v2946_v2  ;;  %3331 = vst.msk [vmem:[%s6038_s3 + $0x5a0] sm:$0xff] %vm3150_vm3, %v3074_v3  ;;  %vm2565_vm10 = vcmp.ge.f32.partialorder %v2091_v63, 0.0  ;;  %v2821_v52 = vmul.f32 0.2, %v2091_v63  ;;  %vm2435_vm11 = vcmp.ge.f32.partialorder %v1571_v4, 0.0  ;;  %v1592_v14 = vadd.f32 %v5129_v11, %v3862_v6 }
 0x14f   :  { %v2691_v9 = vmul.f32 0.2, %v1571_v4  ;;  %vm2563_vm2 = vcmp.ge.f32.partialorder %v2083_v5, 0.0  ;;  %v2819_v10 = vmul.f32 0.2, %v2083_v5  ;;  %v2949_v12 = vsel %vm2437_vm9, %v1579_v62, %v2693_v8  ;;  %v1583_v16 = vpop.f32.mrb[57].mxu0 }
 0x150   :  { %v3077_v13 = vsel %vm2565_vm10, %v2091_v63, %v2821_v52  ;;  %v2104_v15 = vadd.f32 %v5129_v11, %v3990_v7  ;;  %v2095_v17 = vpop.f32.mrb[57].mxu1  ;;  %3206 = vst.msk [vmem:[%s6038_s3 + $0x1b8] sm:$0xff] %vm3150_vm3, %v2949_v12  ;;  %v1584_v20 = vadd.f32 %v5129_v11, %v1583_v16  ;;  %v3863_v22 = vpop.f32.mrb[58].mxu0  ;;  %vm2440_vm12 = vcmp.ge.f32.partialorder %v1592_v14, 0.0 }
 0x151   :  { %3334 = vst.msk [vmem:[%s6038_s3 + $0x5b8] sm:$0xff] %vm3150_vm3, %v3077_v13  ;;  %v2947_v18 = vsel %vm2435_vm11, %v1571_v4, %v2691_v9  ;;  %v3075_v19 = vsel %vm2563_vm2, %v2083_v5, %v2819_v10  ;;  %v2096_v21 = vadd.f32 %v5129_v11, %v2095_v17  ;;  %v3991_v23 = vpop.f32.mrb[58].mxu1  ;;  %v2696_v24 = vmul.f32 0.2, %v1592_v14  ;;  %v1586_v32 = vpop.f32.mrb[59].mxu0 }
 0x152   :  { %3204 = vst.msk [vmem:[%s6038_s3 + $0x1a8] sm:$0xff] %vm3150_vm3, %v2947_v18  ;;  %3332 = vst.msk [vmem:[%s6038_s3 + $0x5a8] sm:$0xff] %vm3150_vm3, %v3075_v19  ;;  %vm2568_vm13 = vcmp.ge.f32.partialorder %v2104_v15, 0.0  ;;  %v2824_v25 = vmul.f32 0.2, %v2104_v15  ;;  %vm2438_vm14 = vcmp.ge.f32.partialorder %v1584_v20, 0.0  ;;  %v1595_v30 = vadd.f32 %v5129_v11, %v3863_v22 }
 0x153   :  { %v2694_v26 = vmul.f32 0.2, %v1584_v20  ;;  %vm2566_vm15 = vcmp.ge.f32.partialorder %v2096_v21, 0.0  ;;  %v2822_v27 = vmul.f32 0.2, %v2096_v21  ;;  %v2952_v28 = vsel %vm2440_vm12, %v1592_v14, %v2696_v24  ;;  %v2098_v33 = vpop.f32.mrb[59].mxu1 }
 0x154   :  { %v3080_v29 = vsel %vm2568_vm13, %v2104_v15, %v2824_v25  ;;  %v2107_v31 = vadd.f32 %v5129_v11, %v3991_v23  ;;  %3209 = vst.msk [vmem:[%s6038_s3 + $0x1d0] sm:$0xff] %vm3150_vm3, %v2952_v28  ;;  %v1587_v36 = vadd.f32 %v5129_v11, %v1586_v32  ;;  %v2099_v37 = vadd.f32 %v5129_v11, %v2098_v33 }
 0x155   :  { %3337 = vst.msk [vmem:[%s6038_s3 + $0x5d0] sm:$0xff] %vm3150_vm3, %v3080_v29  ;;  %v2950_v34 = vsel %vm2438_vm14, %v1584_v20, %v2694_v26  ;;  %v3078_v35 = vsel %vm2566_vm15, %v2096_v21, %v2822_v27  ;;  %v3866_v38 = vpop.f32.mrb[60].mxu0  ;;  %v3994_v39 = vpop.f32.mrb[60].mxu1  ;;  %vm2441_vm0 = vcmp.ge.f32.partialorder %v1595_v30, 0.0  ;;  %v2697_v40 = vmul.f32 0.2, %v1595_v30 }
 0x156   :  { %3207 = vst.msk [vmem:[%s6038_s3 + $0x1c0] sm:$0xff] %vm3150_vm3, %v2950_v34  ;;  %3335 = vst.msk [vmem:[%s6038_s3 + $0x5c0] sm:$0xff] %vm3150_vm3, %v3078_v35  ;;  %vm2569_vm1 = vcmp.ge.f32.partialorder %v2107_v31, 0.0  ;;  %v2825_v41 = vmul.f32 0.2, %v2107_v31  ;;  %vm2439_vm4 = vcmp.ge.f32.partialorder %v1587_v36, 0.0  ;;  %v1608_v46 = vadd.f32 %v5129_v11, %v3866_v38 }
 0x157   :  { %v2695_v42 = vmul.f32 0.2, %v1587_v36  ;;  %vm2567_vm5 = vcmp.ge.f32.partialorder %v2099_v37, 0.0  ;;  %v2823_v43 = vmul.f32 0.2, %v2099_v37  ;;  %v2953_v44 = vsel %vm2441_vm0, %v1595_v30, %v2697_v40  ;;  %v1599_v48 = vpop.f32.mrb[61].mxu0 }
 0x158   :  { %v3081_v45 = vsel %vm2569_vm1, %v2107_v31, %v2825_v41  ;;  %v2120_v47 = vadd.f32 %v5129_v11, %v3994_v39  ;;  %v2111_v49 = vpop.f32.mrb[61].mxu1  ;;  %3210 = vst.msk [vmem:[%s6038_s3 + $0x1d8] sm:$0xff] %vm3150_vm3, %v2953_v44  ;;  %v1600_v53 = vadd.f32 %v5129_v11, %v1599_v48  ;;  %v3867_v55 = vpop.f32.mrb[62].mxu0  ;;  %vm2444_vm6 = vcmp.ge.f32.partialorder %v1608_v46, 0.0 }
 0x159   :  { %3338 = vst.msk [vmem:[%s6038_s3 + $0x5d8] sm:$0xff] %vm3150_vm3, %v3081_v45  ;;  %v2951_v50 = vsel %vm2439_vm4, %v1587_v36, %v2695_v42  ;;  %v3079_v51 = vsel %vm2567_vm5, %v2099_v37, %v2823_v43  ;;  %v2112_v54 = vadd.f32 %v5129_v11, %v2111_v49  ;;  %v3995_v56 = vpop.f32.mrb[62].mxu1  ;;  %v2700_v57 = vmul.f32 0.2, %v1608_v46  ;;  %v1602_v1 = vpop.f32.mrb[63].mxu0 }
 0x15a   :  { %3208 = vst.msk [vmem:[%s6038_s3 + $0x1c8] sm:$0xff] %vm3150_vm3, %v2951_v50  ;;  %3336 = vst.msk [vmem:[%s6038_s3 + $0x5c8] sm:$0xff] %vm3150_vm3, %v3079_v51  ;;  %vm2572_vm7 = vcmp.ge.f32.partialorder %v2120_v47, 0.0  ;;  %v2828_v58 = vmul.f32 0.2, %v2120_v47  ;;  %vm2442_vm8 = vcmp.ge.f32.partialorder %v1600_v53, 0.0  ;;  %v1611_v63 = vadd.f32 %v5129_v11, %v3867_v55 }
 0x15b   :  { %v2698_v59 = vmul.f32 0.2, %v1600_v53  ;;  %vm2570_vm9 = vcmp.ge.f32.partialorder %v2112_v54, 0.0  ;;  %v2826_v60 = vmul.f32 0.2, %v2112_v54  ;;  %v2956_v61 = vsel %vm2444_vm6, %v1608_v46, %v2700_v57  ;;  %v2114_v2 = vpop.f32.mrb[63].mxu1 }
 0x15c   :  { %v3084_v62 = vsel %vm2572_vm7, %v2120_v47, %v2828_v58  ;;  %v2123_v0 = vadd.f32 %v5129_v11, %v3995_v56  ;;  %3213 = vst.msk [vmem:[%s6038_s3 + $0x1f0] sm:$0xff] %vm3150_vm3, %v2956_v61  ;;  %v1603_v5 = vadd.f32 %v5129_v11, %v1602_v1  ;;  %v2115_v6 = vadd.f32 %v5129_v11, %v2114_v2 }
 0x15d   :  { %3341 = vst.msk [vmem:[%s6038_s3 + $0x5f0] sm:$0xff] %vm3150_vm3, %v3084_v62  ;;  %v2954_v3 = vsel %vm2442_vm8, %v1600_v53, %v2698_v59  ;;  %v3082_v4 = vsel %vm2570_vm9, %v2112_v54, %v2826_v60  ;;  %v3870_v7 = vpop.f32.mrb[64].mxu0  ;;  %v3998_v8 = vpop.f32.mrb[64].mxu1  ;;  %vm2445_vm10 = vcmp.ge.f32.partialorder %v1611_v63, 0.0  ;;  %v2701_v52 = vmul.f32 0.2, %v1611_v63 }
 0x15e   :  { %3211 = vst.msk [vmem:[%s6038_s3 + $0x1e0] sm:$0xff] %vm3150_vm3, %v2954_v3  ;;  %3339 = vst.msk [vmem:[%s6038_s3 + $0x5e0] sm:$0xff] %vm3150_vm3, %v3082_v4  ;;  %vm2573_vm11 = vcmp.ge.f32.partialorder %v2123_v0, 0.0  ;;  %v2829_v9 = vmul.f32 0.2, %v2123_v0  ;;  %vm2443_vm2 = vcmp.ge.f32.partialorder %v1603_v5, 0.0  ;;  %v1624_v15 = vadd.f32 %v5129_v11, %v3870_v7 }
 0x15f   :  { %v2699_v10 = vmul.f32 0.2, %v1603_v5  ;;  %vm2571_vm12 = vcmp.ge.f32.partialorder %v2115_v6, 0.0  ;;  %v2827_v12 = vmul.f32 0.2, %v2115_v6  ;;  %v2957_v13 = vsel %vm2445_vm10, %v1611_v63, %v2701_v52  ;;  %v1615_v17 = vpop.f32.mrb[65].mxu0 }
 0x160   :  { %v3085_v14 = vsel %vm2573_vm11, %v2123_v0, %v2829_v9  ;;  %v2136_v16 = vadd.f32 %v5129_v11, %v3998_v8  ;;  %v2127_v18 = vpop.f32.mrb[65].mxu1  ;;  %3214 = vst.msk [vmem:[%s6038_s3 + $0x1f8] sm:$0xff] %vm3150_vm3, %v2957_v13  ;;  %v1616_v21 = vadd.f32 %v5129_v11, %v1615_v17  ;;  %v3871_v23 = vpop.f32.mrb[66].mxu0  ;;  %vm2448_vm13 = vcmp.ge.f32.partialorder %v1624_v15, 0.0 }
 0x161   :  { %3342 = vst.msk [vmem:[%s6038_s3 + $0x5f8] sm:$0xff] %vm3150_vm3, %v3085_v14  ;;  %v2955_v19 = vsel %vm2443_vm2, %v1603_v5, %v2699_v10  ;;  %v3083_v20 = vsel %vm2571_vm12, %v2115_v6, %v2827_v12  ;;  %v2128_v22 = vadd.f32 %v5129_v11, %v2127_v18  ;;  %v3999_v24 = vpop.f32.mrb[66].mxu1  ;;  %v2704_v25 = vmul.f32 0.2, %v1624_v15  ;;  %v1618_v33 = vpop.f32.mrb[67].mxu0 }
 0x162   :  { %3212 = vst.msk [vmem:[%s6038_s3 + $0x1e8] sm:$0xff] %vm3150_vm3, %v2955_v19  ;;  %3340 = vst.msk [vmem:[%s6038_s3 + $0x5e8] sm:$0xff] %vm3150_vm3, %v3083_v20  ;;  %vm2576_vm14 = vcmp.ge.f32.partialorder %v2136_v16, 0.0  ;;  %v2832_v26 = vmul.f32 0.2, %v2136_v16  ;;  %vm2446_vm15 = vcmp.ge.f32.partialorder %v1616_v21, 0.0  ;;  %v1627_v31 = vadd.f32 %v5129_v11, %v3871_v23 }
 0x163   :  { %v2702_v27 = vmul.f32 0.2, %v1616_v21  ;;  %vm2574_vm0 = vcmp.ge.f32.partialorder %v2128_v22, 0.0  ;;  %v2830_v28 = vmul.f32 0.2, %v2128_v22  ;;  %v2960_v29 = vsel %vm2448_vm13, %v1624_v15, %v2704_v25  ;;  %v2130_v34 = vpop.f32.mrb[67].mxu1 }
 0x164   :  { %v3088_v30 = vsel %vm2576_vm14, %v2136_v16, %v2832_v26  ;;  %v2139_v32 = vadd.f32 %v5129_v11, %v3999_v24  ;;  %3217 = vst.msk [vmem:[%s6038_s3 + $0x210] sm:$0xff] %vm3150_vm3, %v2960_v29  ;;  %v1619_v37 = vadd.f32 %v5129_v11, %v1618_v33  ;;  %v2131_v38 = vadd.f32 %v5129_v11, %v2130_v34 }
 0x165   :  { %3345 = vst.msk [vmem:[%s6038_s3 + $0x610] sm:$0xff] %vm3150_vm3, %v3088_v30  ;;  %v2958_v35 = vsel %vm2446_vm15, %v1616_v21, %v2702_v27  ;;  %v3086_v36 = vsel %vm2574_vm0, %v2128_v22, %v2830_v28  ;;  %v3874_v39 = vpop.f32.mrb[68].mxu0  ;;  %v4002_v40 = vpop.f32.mrb[68].mxu1  ;;  %vm2449_vm1 = vcmp.ge.f32.partialorder %v1627_v31, 0.0  ;;  %v2705_v41 = vmul.f32 0.2, %v1627_v31 }
 0x166   :  { %3215 = vst.msk [vmem:[%s6038_s3 + $0x200] sm:$0xff] %vm3150_vm3, %v2958_v35  ;;  %3343 = vst.msk [vmem:[%s6038_s3 + $0x600] sm:$0xff] %vm3150_vm3, %v3086_v36  ;;  %vm2577_vm4 = vcmp.ge.f32.partialorder %v2139_v32, 0.0  ;;  %v2833_v42 = vmul.f32 0.2, %v2139_v32  ;;  %vm2447_vm5 = vcmp.ge.f32.partialorder %v1619_v37, 0.0  ;;  %v1640_v47 = vadd.f32 %v5129_v11, %v3874_v39 }
 0x167   :  { %v2703_v43 = vmul.f32 0.2, %v1619_v37  ;;  %vm2575_vm6 = vcmp.ge.f32.partialorder %v2131_v38, 0.0  ;;  %v2831_v44 = vmul.f32 0.2, %v2131_v38  ;;  %v2961_v45 = vsel %vm2449_vm1, %v1627_v31, %v2705_v41  ;;  %v1631_v49 = vpop.f32.mrb[69].mxu0 }
 0x168   :  { %v3089_v46 = vsel %vm2577_vm4, %v2139_v32, %v2833_v42  ;;  %v2152_v48 = vadd.f32 %v5129_v11, %v4002_v40  ;;  %v2143_v50 = vpop.f32.mrb[69].mxu1  ;;  %3218 = vst.msk [vmem:[%s6038_s3 + $0x218] sm:$0xff] %vm3150_vm3, %v2961_v45  ;;  %v1632_v54 = vadd.f32 %v5129_v11, %v1631_v49  ;;  %v3875_v56 = vpop.f32.mrb[70].mxu0  ;;  %vm2452_vm7 = vcmp.ge.f32.partialorder %v1640_v47, 0.0 }
 0x169   :  { %3346 = vst.msk [vmem:[%s6038_s3 + $0x618] sm:$0xff] %vm3150_vm3, %v3089_v46  ;;  %v2959_v51 = vsel %vm2447_vm5, %v1619_v37, %v2703_v43  ;;  %v3087_v53 = vsel %vm2575_vm6, %v2131_v38, %v2831_v44  ;;  %v2144_v55 = vadd.f32 %v5129_v11, %v2143_v50  ;;  %v4003_v57 = vpop.f32.mrb[70].mxu1  ;;  %v2708_v58 = vmul.f32 0.2, %v1640_v47  ;;  %v1634_v2 = vpop.f32.mrb[71].mxu0 }
 0x16a   :  { %3216 = vst.msk [vmem:[%s6038_s3 + $0x208] sm:$0xff] %vm3150_vm3, %v2959_v51  ;;  %3344 = vst.msk [vmem:[%s6038_s3 + $0x608] sm:$0xff] %vm3150_vm3, %v3087_v53  ;;  %vm2580_vm8 = vcmp.ge.f32.partialorder %v2152_v48, 0.0  ;;  %v2836_v59 = vmul.f32 0.2, %v2152_v48  ;;  %vm2450_vm9 = vcmp.ge.f32.partialorder %v1632_v54, 0.0  ;;  %v1643_v0 = vadd.f32 %v5129_v11, %v3875_v56 }
 0x16b   :  { %v2706_v60 = vmul.f32 0.2, %v1632_v54  ;;  %vm2578_vm10 = vcmp.ge.f32.partialorder %v2144_v55, 0.0  ;;  %v2834_v61 = vmul.f32 0.2, %v2144_v55  ;;  %v2964_v62 = vsel %vm2452_vm7, %v1640_v47, %v2708_v58  ;;  %v2146_v3 = vpop.f32.mrb[71].mxu1 }
 0x16c   :  { %v3092_v63 = vsel %vm2580_vm8, %v2152_v48, %v2836_v59  ;;  %v2155_v1 = vadd.f32 %v5129_v11, %v4003_v57  ;;  %3221 = vst.msk [vmem:[%s6038_s3 + $0x230] sm:$0xff] %vm3150_vm3, %v2964_v62  ;;  %v1635_v6 = vadd.f32 %v5129_v11, %v1634_v2  ;;  %v2147_v7 = vadd.f32 %v5129_v11, %v2146_v3 }
 0x16d   :  { %3349 = vst.msk [vmem:[%s6038_s3 + $0x630] sm:$0xff] %vm3150_vm3, %v3092_v63  ;;  %v2962_v4 = vsel %vm2450_vm9, %v1632_v54, %v2706_v60  ;;  %v3090_v5 = vsel %vm2578_vm10, %v2144_v55, %v2834_v61  ;;  %v3878_v8 = vpop.f32.mrb[72].mxu0  ;;  %v4006_v52 = vpop.f32.mrb[72].mxu1  ;;  %vm2453_vm11 = vcmp.ge.f32.partialorder %v1643_v0, 0.0  ;;  %v2709_v9 = vmul.f32 0.2, %v1643_v0 }
 0x16e   :  { %3219 = vst.msk [vmem:[%s6038_s3 + $0x220] sm:$0xff] %vm3150_vm3, %v2962_v4  ;;  %3347 = vst.msk [vmem:[%s6038_s3 + $0x620] sm:$0xff] %vm3150_vm3, %v3090_v5  ;;  %vm2581_vm2 = vcmp.ge.f32.partialorder %v2155_v1, 0.0  ;;  %v2837_v10 = vmul.f32 0.2, %v2155_v1  ;;  %vm2451_vm12 = vcmp.ge.f32.partialorder %v1635_v6, 0.0  ;;  %v1656_v16 = vadd.f32 %v5129_v11, %v3878_v8 }
 0x16f   :  { %v2707_v12 = vmul.f32 0.2, %v1635_v6  ;;  %vm2579_vm13 = vcmp.ge.f32.partialorder %v2147_v7, 0.0  ;;  %v2835_v13 = vmul.f32 0.2, %v2147_v7  ;;  %v2965_v14 = vsel %vm2453_vm11, %v1643_v0, %v2709_v9  ;;  %v1647_v18 = vpop.f32.mrb[73].mxu0 }
 0x170   :  { %v3093_v15 = vsel %vm2581_vm2, %v2155_v1, %v2837_v10  ;;  %v2168_v17 = vadd.f32 %v5129_v11, %v4006_v52  ;;  %v2159_v19 = vpop.f32.mrb[73].mxu1  ;;  %3222 = vst.msk [vmem:[%s6038_s3 + $0x238] sm:$0xff] %vm3150_vm3, %v2965_v14  ;;  %v1648_v22 = vadd.f32 %v5129_v11, %v1647_v18  ;;  %v3879_v24 = vpop.f32.mrb[74].mxu0  ;;  %vm2456_vm14 = vcmp.ge.f32.partialorder %v1656_v16, 0.0 }
 0x171   :  { %3350 = vst.msk [vmem:[%s6038_s3 + $0x638] sm:$0xff] %vm3150_vm3, %v3093_v15  ;;  %v2963_v20 = vsel %vm2451_vm12, %v1635_v6, %v2707_v12  ;;  %v3091_v21 = vsel %vm2579_vm13, %v2147_v7, %v2835_v13  ;;  %v2160_v23 = vadd.f32 %v5129_v11, %v2159_v19  ;;  %v4007_v25 = vpop.f32.mrb[74].mxu1  ;;  %v2712_v26 = vmul.f32 0.2, %v1656_v16  ;;  %v1650_v34 = vpop.f32.mrb[75].mxu0 }
 0x172   :  { %3220 = vst.msk [vmem:[%s6038_s3 + $0x228] sm:$0xff] %vm3150_vm3, %v2963_v20  ;;  %3348 = vst.msk [vmem:[%s6038_s3 + $0x628] sm:$0xff] %vm3150_vm3, %v3091_v21  ;;  %vm2584_vm15 = vcmp.ge.f32.partialorder %v2168_v17, 0.0  ;;  %v2840_v27 = vmul.f32 0.2, %v2168_v17  ;;  %vm2454_vm0 = vcmp.ge.f32.partialorder %v1648_v22, 0.0  ;;  %v1659_v32 = vadd.f32 %v5129_v11, %v3879_v24 }
 0x173   :  { %v2710_v28 = vmul.f32 0.2, %v1648_v22  ;;  %vm2582_vm1 = vcmp.ge.f32.partialorder %v2160_v23, 0.0  ;;  %v2838_v29 = vmul.f32 0.2, %v2160_v23  ;;  %v2968_v30 = vsel %vm2456_vm14, %v1656_v16, %v2712_v26  ;;  %v2162_v35 = vpop.f32.mrb[75].mxu1 }
 0x174   :  { %v3096_v31 = vsel %vm2584_vm15, %v2168_v17, %v2840_v27  ;;  %v2171_v33 = vadd.f32 %v5129_v11, %v4007_v25  ;;  %3225 = vst.msk [vmem:[%s6038_s3 + $0x250] sm:$0xff] %vm3150_vm3, %v2968_v30  ;;  %v1651_v38 = vadd.f32 %v5129_v11, %v1650_v34  ;;  %v2163_v39 = vadd.f32 %v5129_v11, %v2162_v35 }
 0x175   :  { %3353 = vst.msk [vmem:[%s6038_s3 + $0x650] sm:$0xff] %vm3150_vm3, %v3096_v31  ;;  %v2966_v36 = vsel %vm2454_vm0, %v1648_v22, %v2710_v28  ;;  %v3094_v37 = vsel %vm2582_vm1, %v2160_v23, %v2838_v29  ;;  %v3882_v40 = vpop.f32.mrb[76].mxu0  ;;  %v4010_v41 = vpop.f32.mrb[76].mxu1  ;;  %vm2457_vm4 = vcmp.ge.f32.partialorder %v1659_v32, 0.0  ;;  %v2713_v42 = vmul.f32 0.2, %v1659_v32 }
 0x176   :  { %3223 = vst.msk [vmem:[%s6038_s3 + $0x240] sm:$0xff] %vm3150_vm3, %v2966_v36  ;;  %3351 = vst.msk [vmem:[%s6038_s3 + $0x640] sm:$0xff] %vm3150_vm3, %v3094_v37  ;;  %vm2585_vm5 = vcmp.ge.f32.partialorder %v2171_v33, 0.0  ;;  %v2841_v43 = vmul.f32 0.2, %v2171_v33  ;;  %vm2455_vm6 = vcmp.ge.f32.partialorder %v1651_v38, 0.0  ;;  %v1672_v48 = vadd.f32 %v5129_v11, %v3882_v40 }
 0x177   :  { %v2711_v44 = vmul.f32 0.2, %v1651_v38  ;;  %vm2583_vm7 = vcmp.ge.f32.partialorder %v2163_v39, 0.0  ;;  %v2839_v45 = vmul.f32 0.2, %v2163_v39  ;;  %v2969_v46 = vsel %vm2457_vm4, %v1659_v32, %v2713_v42  ;;  %v1663_v50 = vpop.f32.mrb[77].mxu0 }
 0x178   :  { %v3097_v47 = vsel %vm2585_vm5, %v2171_v33, %v2841_v43  ;;  %v2184_v49 = vadd.f32 %v5129_v11, %v4010_v41  ;;  %v2175_v51 = vpop.f32.mrb[77].mxu1  ;;  %3226 = vst.msk [vmem:[%s6038_s3 + $0x258] sm:$0xff] %vm3150_vm3, %v2969_v46  ;;  %v1664_v55 = vadd.f32 %v5129_v11, %v1663_v50  ;;  %v3883_v57 = vpop.f32.mrb[78].mxu0  ;;  %vm2460_vm8 = vcmp.ge.f32.partialorder %v1672_v48, 0.0 }
 0x179   :  { %3354 = vst.msk [vmem:[%s6038_s3 + $0x658] sm:$0xff] %vm3150_vm3, %v3097_v47  ;;  %v2967_v53 = vsel %vm2455_vm6, %v1651_v38, %v2711_v44  ;;  %v3095_v54 = vsel %vm2583_vm7, %v2163_v39, %v2839_v45  ;;  %v2176_v56 = vadd.f32 %v5129_v11, %v2175_v51  ;;  %v4011_v58 = vpop.f32.mrb[78].mxu1  ;;  %v2716_v59 = vmul.f32 0.2, %v1672_v48  ;;  %v1666_v3 = vpop.f32.mrb[79].mxu0 }
 0x17a   :  { %3224 = vst.msk [vmem:[%s6038_s3 + $0x248] sm:$0xff] %vm3150_vm3, %v2967_v53  ;;  %3352 = vst.msk [vmem:[%s6038_s3 + $0x648] sm:$0xff] %vm3150_vm3, %v3095_v54  ;;  %vm2588_vm9 = vcmp.ge.f32.partialorder %v2184_v49, 0.0  ;;  %v2844_v60 = vmul.f32 0.2, %v2184_v49  ;;  %vm2458_vm10 = vcmp.ge.f32.partialorder %v1664_v55, 0.0  ;;  %v1675_v1 = vadd.f32 %v5129_v11, %v3883_v57 }
 0x17b   :  { %v2714_v61 = vmul.f32 0.2, %v1664_v55  ;;  %vm2586_vm11 = vcmp.ge.f32.partialorder %v2176_v56, 0.0  ;;  %v2842_v62 = vmul.f32 0.2, %v2176_v56  ;;  %v2972_v63 = vsel %vm2460_vm8, %v1672_v48, %v2716_v59  ;;  %v2178_v4 = vpop.f32.mrb[79].mxu1 }
 0x17c   :  { %v3100_v0 = vsel %vm2588_vm9, %v2184_v49, %v2844_v60  ;;  %v2187_v2 = vadd.f32 %v5129_v11, %v4011_v58  ;;  %3229 = vst.msk [vmem:[%s6038_s3 + $0x270] sm:$0xff] %vm3150_vm3, %v2972_v63  ;;  %v1667_v7 = vadd.f32 %v5129_v11, %v1666_v3  ;;  %v2179_v8 = vadd.f32 %v5129_v11, %v2178_v4  ;;  %v5564_v39 = vld [vmem:[%s6037_s2] ss:$0 sm:$0xff] }
 0x17d   :  { %3357 = vst.msk [vmem:[%s6038_s3 + $0x670] sm:$0xff] %vm3150_vm3, %v3100_v0  ;;  %v2970_v5 = vsel %vm2458_vm10, %v1664_v55, %v2714_v61  ;;  %v3098_v6 = vsel %vm2586_vm11, %v2176_v56, %v2842_v62  ;;  %v3886_v52 = vpop.f32.mrb[80].mxu0  ;;  %v4014_v9 = vpop.f32.mrb[80].mxu1  ;;  %vm2461_vm2 = vcmp.ge.f32.partialorder %v1675_v1, 0.0  ;;  %v2717_v10 = vmul.f32 0.2, %v1675_v1 }
 0x17e   :  { %3227 = vst.msk [vmem:[%s6038_s3 + $0x260] sm:$0xff] %vm3150_vm3, %v2970_v5  ;;  %3355 = vst.msk [vmem:[%s6038_s3 + $0x660] sm:$0xff] %vm3150_vm3, %v3098_v6  ;;  %vm2589_vm12 = vcmp.ge.f32.partialorder %v2187_v2, 0.0  ;;  %v2845_v12 = vmul.f32 0.2, %v2187_v2  ;;  %vm2459_vm13 = vcmp.ge.f32.partialorder %v1667_v7, 0.0  ;;  %v1688_v17 = vadd.f32 %v5129_v11, %v3886_v52 }
 0x17f   :  { %v2715_v13 = vmul.f32 0.2, %v1667_v7  ;;  %vm2587_vm14 = vcmp.ge.f32.partialorder %v2179_v8, 0.0  ;;  %v2843_v14 = vmul.f32 0.2, %v2179_v8  ;;  %v2973_v15 = vsel %vm2461_vm2, %v1675_v1, %v2717_v10  ;;  %v1679_v19 = vpop.f32.mrb[81].mxu0 }
 0x180   :  { %v3101_v16 = vsel %vm2589_vm12, %v2187_v2, %v2845_v12  ;;  %v2200_v18 = vadd.f32 %v5129_v11, %v4014_v9  ;;  %v2191_v20 = vpop.f32.mrb[81].mxu1  ;;  %3230 = vst.msk [vmem:[%s6038_s3 + $0x278] sm:$0xff] %vm3150_vm3, %v2973_v15  ;;  %v1680_v23 = vadd.f32 %v5129_v11, %v1679_v19  ;;  %v3887_v25 = vpop.f32.mrb[82].mxu0  ;;  %vm2464_vm15 = vcmp.ge.f32.partialorder %v1688_v17, 0.0 }
 0x181   :  { %3358 = vst.msk [vmem:[%s6038_s3 + $0x678] sm:$0xff] %vm3150_vm3, %v3101_v16  ;;  %v2971_v21 = vsel %vm2459_vm13, %v1667_v7, %v2715_v13  ;;  %v3099_v22 = vsel %vm2587_vm14, %v2179_v8, %v2843_v14  ;;  %v2192_v24 = vadd.f32 %v5129_v11, %v2191_v20  ;;  %v4015_v26 = vpop.f32.mrb[82].mxu1  ;;  %v2720_v27 = vmul.f32 0.2, %v1688_v17  ;;  %v1682_v35 = vpop.f32.mrb[83].mxu0 }
 0x182   :  { %3228 = vst.msk [vmem:[%s6038_s3 + $0x268] sm:$0xff] %vm3150_vm3, %v2971_v21  ;;  %3356 = vst.msk [vmem:[%s6038_s3 + $0x668] sm:$0xff] %vm3150_vm3, %v3099_v22  ;;  %vm2592_vm0 = vcmp.ge.f32.partialorder %v2200_v18, 0.0  ;;  %v2848_v28 = vmul.f32 0.2, %v2200_v18  ;;  %vm2462_vm1 = vcmp.ge.f32.partialorder %v1680_v23, 0.0  ;;  %v1691_v33 = vadd.f32 %v5129_v11, %v3887_v25 }
 0x183   :  { %v2718_v29 = vmul.f32 0.2, %v1680_v23  ;;  %vm2590_vm4 = vcmp.ge.f32.partialorder %v2192_v24, 0.0  ;;  %v2846_v30 = vmul.f32 0.2, %v2192_v24  ;;  %v2976_v31 = vsel %vm2464_vm15, %v1688_v17, %v2720_v27  ;;  %v2194_v36 = vpop.f32.mrb[83].mxu1 }
 0x184   :  { %v3104_v32 = vsel %vm2592_vm0, %v2200_v18, %v2848_v28  ;;  %v2203_v34 = vadd.f32 %v5129_v11, %v4015_v26  ;;  %3233 = vst.msk [vmem:[%s6038_s3 + $0x290] sm:$0xff] %vm3150_vm3, %v2976_v31  ;;  %v1683_v11 = vadd.f32 %v5564_v39, %v1682_v35  ;;  %v2195_v40 = vadd.f32 %v5564_v39, %v2194_v36 }
 0x185   :  { %3361 = vst.msk [vmem:[%s6038_s3 + $0x690] sm:$0xff] %vm3150_vm3, %v3104_v32  ;;  %v2974_v37 = vsel %vm2462_vm1, %v1680_v23, %v2718_v29  ;;  %v3102_v38 = vsel %vm2590_vm4, %v2192_v24, %v2846_v30  ;;  %v3890_v41 = vpop.f32.mrb[84].mxu0  ;;  %v4018_v42 = vpop.f32.mrb[84].mxu1  ;;  %vm2465_vm5 = vcmp.ge.f32.partialorder %v1691_v33, 0.0  ;;  %v2721_v43 = vmul.f32 0.2, %v1691_v33 }
 0x186   :  { %3231 = vst.msk [vmem:[%s6038_s3 + $0x280] sm:$0xff] %vm3150_vm3, %v2974_v37  ;;  %3359 = vst.msk [vmem:[%s6038_s3 + $0x680] sm:$0xff] %vm3150_vm3, %v3102_v38  ;;  %vm2593_vm6 = vcmp.ge.f32.partialorder %v2203_v34, 0.0  ;;  %v2849_v44 = vmul.f32 0.2, %v2203_v34  ;;  %vm2463_vm7 = vcmp.ge.f32.partialorder %v1683_v11, 0.0  ;;  %v1704_v49 = vadd.f32 %v5564_v39, %v3890_v41 }
 0x187   :  { %v2719_v45 = vmul.f32 0.2, %v1683_v11  ;;  %vm2591_vm8 = vcmp.ge.f32.partialorder %v2195_v40, 0.0  ;;  %v2847_v46 = vmul.f32 0.2, %v2195_v40  ;;  %v2977_v47 = vsel %vm2465_vm5, %v1691_v33, %v2721_v43  ;;  %v1695_v51 = vpop.f32.mrb[85].mxu0 }
 0x188   :  { %v3105_v48 = vsel %vm2593_vm6, %v2203_v34, %v2849_v44  ;;  %v2216_v50 = vadd.f32 %v5564_v39, %v4018_v42  ;;  %v2207_v53 = vpop.f32.mrb[85].mxu1  ;;  %3234 = vst.msk [vmem:[%s6038_s3 + $0x298] sm:$0xff] %vm3150_vm3, %v2977_v47  ;;  %v1696_v56 = vadd.f32 %v5564_v39, %v1695_v51  ;;  %v3891_v58 = vpop.f32.mrb[86].mxu0  ;;  %vm2468_vm9 = vcmp.ge.f32.partialorder %v1704_v49, 0.0 }
 0x189   :  { %3362 = vst.msk [vmem:[%s6038_s3 + $0x698] sm:$0xff] %vm3150_vm3, %v3105_v48  ;;  %v2975_v54 = vsel %vm2463_vm7, %v1683_v11, %v2719_v45  ;;  %v3103_v55 = vsel %vm2591_vm8, %v2195_v40, %v2847_v46  ;;  %v2208_v57 = vadd.f32 %v5564_v39, %v2207_v53  ;;  %v4019_v59 = vpop.f32.mrb[86].mxu1  ;;  %v2724_v60 = vmul.f32 0.2, %v1704_v49  ;;  %v1698_v4 = vpop.f32.mrb[87].mxu0 }
 0x18a   :  { %3232 = vst.msk [vmem:[%s6038_s3 + $0x288] sm:$0xff] %vm3150_vm3, %v2975_v54  ;;  %3360 = vst.msk [vmem:[%s6038_s3 + $0x688] sm:$0xff] %vm3150_vm3, %v3103_v55  ;;  %vm2596_vm10 = vcmp.ge.f32.partialorder %v2216_v50, 0.0  ;;  %v2852_v61 = vmul.f32 0.2, %v2216_v50  ;;  %vm2466_vm11 = vcmp.ge.f32.partialorder %v1696_v56, 0.0  ;;  %v1707_v2 = vadd.f32 %v5564_v39, %v3891_v58 }
 0x18b   :  { %v2722_v62 = vmul.f32 0.2, %v1696_v56  ;;  %vm2594_vm2 = vcmp.ge.f32.partialorder %v2208_v57, 0.0  ;;  %v2850_v63 = vmul.f32 0.2, %v2208_v57  ;;  %v2980_v0 = vsel %vm2468_vm9, %v1704_v49, %v2724_v60  ;;  %v2210_v5 = vpop.f32.mrb[87].mxu1 }
 0x18c   :  { %v3108_v1 = vsel %vm2596_vm10, %v2216_v50, %v2852_v61  ;;  %v2219_v3 = vadd.f32 %v5564_v39, %v4019_v59  ;;  %3237 = vst.msk [vmem:[%s6038_s3 + $0x2b0] sm:$0xff] %vm3150_vm3, %v2980_v0  ;;  %v1699_v8 = vadd.f32 %v5564_v39, %v1698_v4  ;;  %v2211_v52 = vadd.f32 %v5564_v39, %v2210_v5 }
 0x18d   :  { %3365 = vst.msk [vmem:[%s6038_s3 + $0x6b0] sm:$0xff] %vm3150_vm3, %v3108_v1  ;;  %v2978_v6 = vsel %vm2466_vm11, %v1696_v56, %v2722_v62  ;;  %v3106_v7 = vsel %vm2594_vm2, %v2208_v57, %v2850_v63  ;;  %v3894_v9 = vpop.f32.mrb[88].mxu0  ;;  %v4022_v10 = vpop.f32.mrb[88].mxu1  ;;  %vm2469_vm12 = vcmp.ge.f32.partialorder %v1707_v2, 0.0  ;;  %v2725_v12 = vmul.f32 0.2, %v1707_v2 }
 0x18e   :  { %3235 = vst.msk [vmem:[%s6038_s3 + $0x2a0] sm:$0xff] %vm3150_vm3, %v2978_v6  ;;  %3363 = vst.msk [vmem:[%s6038_s3 + $0x6a0] sm:$0xff] %vm3150_vm3, %v3106_v7  ;;  %vm2597_vm13 = vcmp.ge.f32.partialorder %v2219_v3, 0.0  ;;  %v2853_v13 = vmul.f32 0.2, %v2219_v3  ;;  %vm2467_vm14 = vcmp.ge.f32.partialorder %v1699_v8, 0.0  ;;  %v1720_v18 = vadd.f32 %v5564_v39, %v3894_v9 }
 0x18f   :  { %v2723_v14 = vmul.f32 0.2, %v1699_v8  ;;  %vm2595_vm15 = vcmp.ge.f32.partialorder %v2211_v52, 0.0  ;;  %v2851_v15 = vmul.f32 0.2, %v2211_v52  ;;  %v2981_v16 = vsel %vm2469_vm12, %v1707_v2, %v2725_v12  ;;  %v1711_v20 = vpop.f32.mrb[89].mxu0 }
 0x190   :  { %v3109_v17 = vsel %vm2597_vm13, %v2219_v3, %v2853_v13  ;;  %v2232_v19 = vadd.f32 %v5564_v39, %v4022_v10  ;;  %v2223_v21 = vpop.f32.mrb[89].mxu1  ;;  %3238 = vst.msk [vmem:[%s6038_s3 + $0x2b8] sm:$0xff] %vm3150_vm3, %v2981_v16  ;;  %v1712_v24 = vadd.f32 %v5564_v39, %v1711_v20  ;;  %v3895_v26 = vpop.f32.mrb[90].mxu0  ;;  %vm2472_vm0 = vcmp.ge.f32.partialorder %v1720_v18, 0.0 }
 0x191   :  { %3366 = vst.msk [vmem:[%s6038_s3 + $0x6b8] sm:$0xff] %vm3150_vm3, %v3109_v17  ;;  %v2979_v22 = vsel %vm2467_vm14, %v1699_v8, %v2723_v14  ;;  %v3107_v23 = vsel %vm2595_vm15, %v2211_v52, %v2851_v15  ;;  %v2224_v25 = vadd.f32 %v5564_v39, %v2223_v21  ;;  %v4023_v27 = vpop.f32.mrb[90].mxu1  ;;  %v2728_v28 = vmul.f32 0.2, %v1720_v18  ;;  %v1714_v36 = vpop.f32.mrb[91].mxu0 }
 0x192   :  { %3236 = vst.msk [vmem:[%s6038_s3 + $0x2a8] sm:$0xff] %vm3150_vm3, %v2979_v22  ;;  %3364 = vst.msk [vmem:[%s6038_s3 + $0x6a8] sm:$0xff] %vm3150_vm3, %v3107_v23  ;;  %vm2600_vm1 = vcmp.ge.f32.partialorder %v2232_v19, 0.0  ;;  %v2856_v29 = vmul.f32 0.2, %v2232_v19  ;;  %vm2470_vm4 = vcmp.ge.f32.partialorder %v1712_v24, 0.0  ;;  %v1723_v34 = vadd.f32 %v5564_v39, %v3895_v26 }
 0x193   :  { %v2726_v30 = vmul.f32 0.2, %v1712_v24  ;;  %vm2598_vm5 = vcmp.ge.f32.partialorder %v2224_v25, 0.0  ;;  %v2854_v31 = vmul.f32 0.2, %v2224_v25  ;;  %v2984_v32 = vsel %vm2472_vm0, %v1720_v18, %v2728_v28  ;;  %v2226_v37 = vpop.f32.mrb[91].mxu1 }
 0x194   :  { %v3112_v33 = vsel %vm2600_vm1, %v2232_v19, %v2856_v29  ;;  %v2235_v35 = vadd.f32 %v5564_v39, %v4023_v27  ;;  %3241 = vst.msk [vmem:[%s6038_s3 + $0x2d0] sm:$0xff] %vm3150_vm3, %v2984_v32  ;;  %v1715_v40 = vadd.f32 %v5564_v39, %v1714_v36  ;;  %v2227_v41 = vadd.f32 %v5564_v39, %v2226_v37 }
 0x195   :  { %3369 = vst.msk [vmem:[%s6038_s3 + $0x6d0] sm:$0xff] %vm3150_vm3, %v3112_v33  ;;  %v2982_v38 = vsel %vm2470_vm4, %v1712_v24, %v2726_v30  ;;  %v3110_v11 = vsel %vm2598_vm5, %v2224_v25, %v2854_v31  ;;  %v3898_v42 = vpop.f32.mrb[92].mxu0  ;;  %v4026_v43 = vpop.f32.mrb[92].mxu1  ;;  %vm2473_vm6 = vcmp.ge.f32.partialorder %v1723_v34, 0.0  ;;  %v2729_v44 = vmul.f32 0.2, %v1723_v34 }
 0x196   :  { %3239 = vst.msk [vmem:[%s6038_s3 + $0x2c0] sm:$0xff] %vm3150_vm3, %v2982_v38  ;;  %3367 = vst.msk [vmem:[%s6038_s3 + $0x6c0] sm:$0xff] %vm3150_vm3, %v3110_v11  ;;  %vm2601_vm7 = vcmp.ge.f32.partialorder %v2235_v35, 0.0  ;;  %v2857_v45 = vmul.f32 0.2, %v2235_v35  ;;  %vm2471_vm8 = vcmp.ge.f32.partialorder %v1715_v40, 0.0  ;;  %v1736_v50 = vadd.f32 %v5564_v39, %v3898_v42 }
 0x197   :  { %v2727_v46 = vmul.f32 0.2, %v1715_v40  ;;  %vm2599_vm9 = vcmp.ge.f32.partialorder %v2227_v41, 0.0  ;;  %v2855_v47 = vmul.f32 0.2, %v2227_v41  ;;  %v2985_v48 = vsel %vm2473_vm6, %v1723_v34, %v2729_v44  ;;  %v1727_v53 = vpop.f32.mrb[93].mxu0 }
 0x198   :  { %v3113_v49 = vsel %vm2601_vm7, %v2235_v35, %v2857_v45  ;;  %v2248_v51 = vadd.f32 %v5564_v39, %v4026_v43  ;;  %v2239_v54 = vpop.f32.mrb[93].mxu1  ;;  %3242 = vst.msk [vmem:[%s6038_s3 + $0x2d8] sm:$0xff] %vm3150_vm3, %v2985_v48  ;;  %v1728_v57 = vadd.f32 %v5564_v39, %v1727_v53  ;;  %v3899_v59 = vpop.f32.mrb[94].mxu0  ;;  %vm2476_vm10 = vcmp.ge.f32.partialorder %v1736_v50, 0.0 }
 0x199   :  { %3370 = vst.msk [vmem:[%s6038_s3 + $0x6d8] sm:$0xff] %vm3150_vm3, %v3113_v49  ;;  %v2983_v55 = vsel %vm2471_vm8, %v1715_v40, %v2727_v46  ;;  %v3111_v56 = vsel %vm2599_vm9, %v2227_v41, %v2855_v47  ;;  %v2240_v58 = vadd.f32 %v5564_v39, %v2239_v54  ;;  %v4027_v60 = vpop.f32.mrb[94].mxu1  ;;  %v2732_v61 = vmul.f32 0.2, %v1736_v50  ;;  %v1730_v5 = vpop.f32.mrb[95].mxu0 }
 0x19a   :  { %3240 = vst.msk [vmem:[%s6038_s3 + $0x2c8] sm:$0xff] %vm3150_vm3, %v2983_v55  ;;  %3368 = vst.msk [vmem:[%s6038_s3 + $0x6c8] sm:$0xff] %vm3150_vm3, %v3111_v56  ;;  %vm2604_vm11 = vcmp.ge.f32.partialorder %v2248_v51, 0.0  ;;  %v2860_v62 = vmul.f32 0.2, %v2248_v51  ;;  %vm2474_vm2 = vcmp.ge.f32.partialorder %v1728_v57, 0.0  ;;  %v1739_v3 = vadd.f32 %v5564_v39, %v3899_v59 }
 0x19b   :  { %v2730_v63 = vmul.f32 0.2, %v1728_v57  ;;  %vm2602_vm12 = vcmp.ge.f32.partialorder %v2240_v58, 0.0  ;;  %v2858_v0 = vmul.f32 0.2, %v2240_v58  ;;  %v2988_v1 = vsel %vm2476_vm10, %v1736_v50, %v2732_v61  ;;  %v2242_v6 = vpop.f32.mrb[95].mxu1 }
 0x19c   :  { %v3116_v2 = vsel %vm2604_vm11, %v2248_v51, %v2860_v62  ;;  %v2251_v4 = vadd.f32 %v5564_v39, %v4027_v60  ;;  %3245 = vst.msk [vmem:[%s6038_s3 + $0x2f0] sm:$0xff] %vm3150_vm3, %v2988_v1  ;;  %v1731_v52 = vadd.f32 %v5564_v39, %v1730_v5  ;;  %v2243_v9 = vadd.f32 %v5564_v39, %v2242_v6 }
 0x19d   :  { %3373 = vst.msk [vmem:[%s6038_s3 + $0x6f0] sm:$0xff] %vm3150_vm3, %v3116_v2  ;;  %v2986_v7 = vsel %vm2474_vm2, %v1728_v57, %v2730_v63  ;;  %v3114_v8 = vsel %vm2602_vm12, %v2240_v58, %v2858_v0  ;;  %v3902_v10 = vpop.f32.mrb[96].mxu0  ;;  %v4030_v12 = vpop.f32.mrb[96].mxu1  ;;  %vm2477_vm13 = vcmp.ge.f32.partialorder %v1739_v3, 0.0  ;;  %v2733_v13 = vmul.f32 0.2, %v1739_v3 }
 0x19e   :  { %3243 = vst.msk [vmem:[%s6038_s3 + $0x2e0] sm:$0xff] %vm3150_vm3, %v2986_v7  ;;  %3371 = vst.msk [vmem:[%s6038_s3 + $0x6e0] sm:$0xff] %vm3150_vm3, %v3114_v8  ;;  %vm2605_vm14 = vcmp.ge.f32.partialorder %v2251_v4, 0.0  ;;  %v2861_v14 = vmul.f32 0.2, %v2251_v4  ;;  %vm2475_vm15 = vcmp.ge.f32.partialorder %v1731_v52, 0.0  ;;  %v1752_v19 = vadd.f32 %v5564_v39, %v3902_v10 }
 0x19f   :  { %v2731_v15 = vmul.f32 0.2, %v1731_v52  ;;  %vm2603_vm0 = vcmp.ge.f32.partialorder %v2243_v9, 0.0  ;;  %v2859_v16 = vmul.f32 0.2, %v2243_v9  ;;  %v2989_v17 = vsel %vm2477_vm13, %v1739_v3, %v2733_v13  ;;  %v1743_v21 = vpop.f32.mrb[97].mxu0 }
 0x1a0   :  { %v3117_v18 = vsel %vm2605_vm14, %v2251_v4, %v2861_v14  ;;  %v2264_v20 = vadd.f32 %v5564_v39, %v4030_v12  ;;  %v2255_v22 = vpop.f32.mrb[97].mxu1  ;;  %3246 = vst.msk [vmem:[%s6038_s3 + $0x2f8] sm:$0xff] %vm3150_vm3, %v2989_v17  ;;  %v1744_v25 = vadd.f32 %v5564_v39, %v1743_v21  ;;  %v3903_v27 = vpop.f32.mrb[98].mxu0  ;;  %vm2480_vm1 = vcmp.ge.f32.partialorder %v1752_v19, 0.0 }
 0x1a1   :  { %3374 = vst.msk [vmem:[%s6038_s3 + $0x6f8] sm:$0xff] %vm3150_vm3, %v3117_v18  ;;  %v2987_v23 = vsel %vm2475_vm15, %v1731_v52, %v2731_v15  ;;  %v3115_v24 = vsel %vm2603_vm0, %v2243_v9, %v2859_v16  ;;  %v2256_v26 = vadd.f32 %v5564_v39, %v2255_v22  ;;  %v4031_v28 = vpop.f32.mrb[98].mxu1  ;;  %v2736_v29 = vmul.f32 0.2, %v1752_v19  ;;  %v1746_v37 = vpop.f32.mrb[99].mxu0 }
 0x1a2   :  { %3244 = vst.msk [vmem:[%s6038_s3 + $0x2e8] sm:$0xff] %vm3150_vm3, %v2987_v23  ;;  %3372 = vst.msk [vmem:[%s6038_s3 + $0x6e8] sm:$0xff] %vm3150_vm3, %v3115_v24  ;;  %vm2608_vm4 = vcmp.ge.f32.partialorder %v2264_v20, 0.0  ;;  %v2864_v30 = vmul.f32 0.2, %v2264_v20  ;;  %vm2478_vm5 = vcmp.ge.f32.partialorder %v1744_v25, 0.0  ;;  %v1755_v35 = vadd.f32 %v5564_v39, %v3903_v27 }
 0x1a3   :  { %v2734_v31 = vmul.f32 0.2, %v1744_v25  ;;  %vm2606_vm6 = vcmp.ge.f32.partialorder %v2256_v26, 0.0  ;;  %v2862_v32 = vmul.f32 0.2, %v2256_v26  ;;  %v2992_v33 = vsel %vm2480_vm1, %v1752_v19, %v2736_v29  ;;  %v2258_v38 = vpop.f32.mrb[99].mxu1 }
 0x1a4   :  { %v3120_v34 = vsel %vm2608_vm4, %v2264_v20, %v2864_v30  ;;  %v2267_v36 = vadd.f32 %v5564_v39, %v4031_v28  ;;  %3249 = vst.msk [vmem:[%s6038_s3 + $0x310] sm:$0xff] %vm3150_vm3, %v2992_v33  ;;  %v1747_v41 = vadd.f32 %v5564_v39, %v1746_v37  ;;  %v2259_v42 = vadd.f32 %v5564_v39, %v2258_v38 }
 0x1a5   :  { %3377 = vst.msk [vmem:[%s6038_s3 + $0x710] sm:$0xff] %vm3150_vm3, %v3120_v34  ;;  %v2990_v11 = vsel %vm2478_vm5, %v1744_v25, %v2734_v31  ;;  %v3118_v40 = vsel %vm2606_vm6, %v2256_v26, %v2862_v32  ;;  %v3906_v43 = vpop.f32.mrb[100].mxu0  ;;  %v4034_v44 = vpop.f32.mrb[100].mxu1  ;;  %vm2481_vm7 = vcmp.ge.f32.partialorder %v1755_v35, 0.0  ;;  %v2737_v45 = vmul.f32 0.2, %v1755_v35 }
 0x1a6   :  { %3247 = vst.msk [vmem:[%s6038_s3 + $0x300] sm:$0xff] %vm3150_vm3, %v2990_v11  ;;  %3375 = vst.msk [vmem:[%s6038_s3 + $0x700] sm:$0xff] %vm3150_vm3, %v3118_v40  ;;  %vm2609_vm8 = vcmp.ge.f32.partialorder %v2267_v36, 0.0  ;;  %v2865_v46 = vmul.f32 0.2, %v2267_v36  ;;  %vm2479_vm9 = vcmp.ge.f32.partialorder %v1747_v41, 0.0  ;;  %v1768_v51 = vadd.f32 %v5564_v39, %v3906_v43 }
 0x1a7   :  { %v2735_v47 = vmul.f32 0.2, %v1747_v41  ;;  %vm2607_vm10 = vcmp.ge.f32.partialorder %v2259_v42, 0.0  ;;  %v2863_v48 = vmul.f32 0.2, %v2259_v42  ;;  %v2993_v49 = vsel %vm2481_vm7, %v1755_v35, %v2737_v45  ;;  %v1759_v54 = vpop.f32.mrb[101].mxu0 }
 0x1a8   :  { %v3121_v50 = vsel %vm2609_vm8, %v2267_v36, %v2865_v46  ;;  %v2280_v53 = vadd.f32 %v5564_v39, %v4034_v44  ;;  %v2271_v55 = vpop.f32.mrb[101].mxu1  ;;  %3250 = vst.msk [vmem:[%s6038_s3 + $0x318] sm:$0xff] %vm3150_vm3, %v2993_v49  ;;  %v1760_v58 = vadd.f32 %v5564_v39, %v1759_v54  ;;  %v3907_v60 = vpop.f32.mrb[102].mxu0  ;;  %vm2484_vm11 = vcmp.ge.f32.partialorder %v1768_v51, 0.0 }
 0x1a9   :  { %3378 = vst.msk [vmem:[%s6038_s3 + $0x718] sm:$0xff] %vm3150_vm3, %v3121_v50  ;;  %v2991_v56 = vsel %vm2479_vm9, %v1747_v41, %v2735_v47  ;;  %v3119_v57 = vsel %vm2607_vm10, %v2259_v42, %v2863_v48  ;;  %v2272_v59 = vadd.f32 %v5564_v39, %v2271_v55  ;;  %v4035_v61 = vpop.f32.mrb[102].mxu1  ;;  %v2740_v62 = vmul.f32 0.2, %v1768_v51  ;;  %v1762_v6 = vpop.f32.mrb[103].mxu0 }
 0x1aa   :  { %3248 = vst.msk [vmem:[%s6038_s3 + $0x308] sm:$0xff] %vm3150_vm3, %v2991_v56  ;;  %3376 = vst.msk [vmem:[%s6038_s3 + $0x708] sm:$0xff] %vm3150_vm3, %v3119_v57  ;;  %vm2612_vm2 = vcmp.ge.f32.partialorder %v2280_v53, 0.0  ;;  %v2868_v63 = vmul.f32 0.2, %v2280_v53  ;;  %vm2482_vm12 = vcmp.ge.f32.partialorder %v1760_v58, 0.0  ;;  %v1771_v4 = vadd.f32 %v5564_v39, %v3907_v60 }
 0x1ab   :  { %v2738_v0 = vmul.f32 0.2, %v1760_v58  ;;  %vm2610_vm13 = vcmp.ge.f32.partialorder %v2272_v59, 0.0  ;;  %v2866_v1 = vmul.f32 0.2, %v2272_v59  ;;  %v2996_v2 = vsel %vm2484_vm11, %v1768_v51, %v2740_v62  ;;  %v2274_v7 = vpop.f32.mrb[103].mxu1 }
 0x1ac   :  { %v3124_v3 = vsel %vm2612_vm2, %v2280_v53, %v2868_v63  ;;  %v2283_v5 = vadd.f32 %v5564_v39, %v4035_v61  ;;  %3253 = vst.msk [vmem:[%s6038_s3 + $0x330] sm:$0xff] %vm3150_vm3, %v2996_v2  ;;  %v1763_v9 = vadd.f32 %v5564_v39, %v1762_v6  ;;  %v2275_v10 = vadd.f32 %v5564_v39, %v2274_v7 }
 0x1ad   :  { %3381 = vst.msk [vmem:[%s6038_s3 + $0x730] sm:$0xff] %vm3150_vm3, %v3124_v3  ;;  %v2994_v8 = vsel %vm2482_vm12, %v1760_v58, %v2738_v0  ;;  %v3122_v52 = vsel %vm2610_vm13, %v2272_v59, %v2866_v1  ;;  %v3910_v12 = vpop.f32.mrb[104].mxu0  ;;  %v4038_v13 = vpop.f32.mrb[104].mxu1  ;;  %vm2485_vm14 = vcmp.ge.f32.partialorder %v1771_v4, 0.0  ;;  %v2741_v14 = vmul.f32 0.2, %v1771_v4 }
 0x1ae   :  { %3251 = vst.msk [vmem:[%s6038_s3 + $0x320] sm:$0xff] %vm3150_vm3, %v2994_v8  ;;  %3379 = vst.msk [vmem:[%s6038_s3 + $0x720] sm:$0xff] %vm3150_vm3, %v3122_v52  ;;  %vm2613_vm15 = vcmp.ge.f32.partialorder %v2283_v5, 0.0  ;;  %v2869_v15 = vmul.f32 0.2, %v2283_v5  ;;  %vm2483_vm0 = vcmp.ge.f32.partialorder %v1763_v9, 0.0  ;;  %v1784_v20 = vadd.f32 %v5564_v39, %v3910_v12 }
 0x1af   :  { %v2739_v16 = vmul.f32 0.2, %v1763_v9  ;;  %vm2611_vm1 = vcmp.ge.f32.partialorder %v2275_v10, 0.0  ;;  %v2867_v17 = vmul.f32 0.2, %v2275_v10  ;;  %v2997_v18 = vsel %vm2485_vm14, %v1771_v4, %v2741_v14  ;;  %v1775_v22 = vpop.f32.mrb[105].mxu0 }
 0x1b0   :  { %v3125_v19 = vsel %vm2613_vm15, %v2283_v5, %v2869_v15  ;;  %v2296_v21 = vadd.f32 %v5564_v39, %v4038_v13  ;;  %v2287_v23 = vpop.f32.mrb[105].mxu1  ;;  %3254 = vst.msk [vmem:[%s6038_s3 + $0x338] sm:$0xff] %vm3150_vm3, %v2997_v18  ;;  %v1776_v26 = vadd.f32 %v5564_v39, %v1775_v22  ;;  %v3911_v28 = vpop.f32.mrb[106].mxu0  ;;  %vm2488_vm4 = vcmp.ge.f32.partialorder %v1784_v20, 0.0 }
 0x1b1   :  { %3382 = vst.msk [vmem:[%s6038_s3 + $0x738] sm:$0xff] %vm3150_vm3, %v3125_v19  ;;  %v2995_v24 = vsel %vm2483_vm0, %v1763_v9, %v2739_v16  ;;  %v3123_v25 = vsel %vm2611_vm1, %v2275_v10, %v2867_v17  ;;  %v2288_v27 = vadd.f32 %v5564_v39, %v2287_v23  ;;  %v4039_v29 = vpop.f32.mrb[106].mxu1  ;;  %v2744_v30 = vmul.f32 0.2, %v1784_v20  ;;  %v1778_v38 = vpop.f32.mrb[107].mxu0 }
 0x1b2   :  { %3252 = vst.msk [vmem:[%s6038_s3 + $0x328] sm:$0xff] %vm3150_vm3, %v2995_v24  ;;  %3380 = vst.msk [vmem:[%s6038_s3 + $0x728] sm:$0xff] %vm3150_vm3, %v3123_v25  ;;  %vm2616_vm5 = vcmp.ge.f32.partialorder %v2296_v21, 0.0  ;;  %v2872_v31 = vmul.f32 0.2, %v2296_v21  ;;  %vm2486_vm6 = vcmp.ge.f32.partialorder %v1776_v26, 0.0  ;;  %v1787_v36 = vadd.f32 %v5564_v39, %v3911_v28 }
 0x1b3   :  { %v2742_v32 = vmul.f32 0.2, %v1776_v26  ;;  %vm2614_vm7 = vcmp.ge.f32.partialorder %v2288_v27, 0.0  ;;  %v2870_v33 = vmul.f32 0.2, %v2288_v27  ;;  %v3000_v34 = vsel %vm2488_vm4, %v1784_v20, %v2744_v30  ;;  %v2290_v11 = vpop.f32.mrb[107].mxu1 }
 0x1b4   :  { %v3128_v35 = vsel %vm2616_vm5, %v2296_v21, %v2872_v31  ;;  %v2299_v37 = vadd.f32 %v5564_v39, %v4039_v29  ;;  %3257 = vst.msk [vmem:[%s6038_s3 + $0x350] sm:$0xff] %vm3150_vm3, %v3000_v34  ;;  %v1779_v42 = vadd.f32 %v5564_v39, %v1778_v38  ;;  %v2291_v43 = vadd.f32 %v5564_v39, %v2290_v11 }
 0x1b5   :  { %3385 = vst.msk [vmem:[%s6038_s3 + $0x750] sm:$0xff] %vm3150_vm3, %v3128_v35  ;;  %v2998_v40 = vsel %vm2486_vm6, %v1776_v26, %v2742_v32  ;;  %v3126_v41 = vsel %vm2614_vm7, %v2288_v27, %v2870_v33  ;;  %v3914_v44 = vpop.f32.mrb[108].mxu0  ;;  %vm2489_vm8 = vcmp.ge.f32.partialorder %v1787_v36, 0.0  ;;  %v2745_v45 = vmul.f32 0.2, %v1787_v36 }
 0x1b6   :  { %3255 = vst.msk [vmem:[%s6038_s3 + $0x340] sm:$0xff] %vm3150_vm3, %v2998_v40  ;;  %3383 = vst.msk [vmem:[%s6038_s3 + $0x740] sm:$0xff] %vm3150_vm3, %v3126_v41  ;;  %vm2617_vm9 = vcmp.ge.f32.partialorder %v2299_v37, 0.0  ;;  %v2873_v46 = vmul.f32 0.2, %v2299_v37  ;;  %vm2487_vm10 = vcmp.ge.f32.partialorder %v1779_v42, 0.0  ;;  %v1800_v51 = vadd.f32 %v5564_v39, %v3914_v44 }
 0x1b7   :  { %v2743_v47 = vmul.f32 0.2, %v1779_v42  ;;  %vm2615_vm11 = vcmp.ge.f32.partialorder %v2291_v43, 0.0  ;;  %v2871_v48 = vmul.f32 0.2, %v2291_v43  ;;  %v3001_v49 = vsel %vm2489_vm8, %v1787_v36, %v2745_v45  ;;  %v4042_v53 = vpop.f32.mrb[108].mxu1 }
 0x1b8   :  { %v3129_v50 = vsel %vm2617_vm9, %v2299_v37, %v2873_v46  ;;  %v1791_v54 = vpop.f32.mrb[109].mxu0  ;;  %3258 = vst.msk [vmem:[%s6038_s3 + $0x358] sm:$0xff] %vm3150_vm3, %v3001_v49  ;;  %v2312_v57 = vadd.f32 %v5564_v39, %v4042_v53  ;;  %v2303_v59 = vpop.f32.mrb[109].mxu1  ;;  %vm2492_vm2 = vcmp.ge.f32.partialorder %v1800_v51, 0.0  ;;  %v2748_v61 = vmul.f32 0.2, %v1800_v51 }
 0x1b9   :  { %3386 = vst.msk [vmem:[%s6038_s3 + $0x758] sm:$0xff] %vm3150_vm3, %v3129_v50  ;;  %v2999_v55 = vsel %vm2487_vm10, %v1779_v42, %v2743_v47  ;;  %v3127_v56 = vsel %vm2615_vm11, %v2291_v43, %v2871_v48  ;;  %v1792_v58 = vadd.f32 %v5564_v39, %v1791_v54  ;;  %v3915_v60 = vpop.f32.mrb[110].mxu0  ;;  %v2304_v62 = vadd.f32 %v5564_v39, %v2303_v59  ;;  %v4043_v0 = vpop.f32.mrb[110].mxu1 }
 0x1ba   :  { %3256 = vst.msk [vmem:[%s6038_s3 + $0x348] sm:$0xff] %vm3150_vm3, %v2999_v55  ;;  %3384 = vst.msk [vmem:[%s6038_s3 + $0x748] sm:$0xff] %vm3150_vm3, %v3127_v56  ;;  %v1803_v63 = vadd.f32 %v5564_v39, %v3915_v60  ;;  %v1794_v1 = vpop.f32.mrb[111].mxu0  ;;  %vm2620_vm12 = vcmp.ge.f32.partialorder %v2312_v57, 0.0  ;;  %v2876_v2 = vmul.f32 0.2, %v2312_v57  ;;  %v3004_v4 = vsel %vm2492_vm2, %v1800_v51, %v2748_v61 }
 0x1bb   :  { %vm2490_vm13 = vcmp.ge.f32.partialorder %v1792_v58, 0.0  ;;  %v2746_v3 = vmul.f32 0.2, %v1792_v58  ;;  %vm2618_vm14 = vcmp.ge.f32.partialorder %v2304_v62, 0.0  ;;  %v2874_v5 = vmul.f32 0.2, %v2304_v62 }
 0x1bc   :  { %vm2493_vm15 = vcmp.ge.f32.partialorder %v1803_v63, 0.0  ;;  %v2306_v6 = vpop.f32.mrb[111].mxu1  ;;  %3261 = vst.msk [vmem:[%s6038_s3 + $0x370] sm:$0xff] %vm3150_vm3, %v3004_v4  ;;  %v3132_v7 = vsel %vm2620_vm12, %v2312_v57, %v2876_v2  ;;  %v2749_v52 = vmul.f32 0.2, %v1803_v63  ;;  %v2315_v9 = vadd.f32 %v5564_v39, %v4043_v0 }
 0x1bd   :  { %v3002_v8 = vsel %vm2490_vm13, %v1792_v58, %v2746_v3  ;;  %v3918_v10 = vpop.f32.mrb[112].mxu0  ;;  %3389 = vst.msk [vmem:[%s6038_s3 + $0x770] sm:$0xff] %vm3150_vm3, %v3132_v7  ;;  %v3130_v12 = vsel %vm2618_vm14, %v2304_v62, %v2874_v5  ;;  %v1795_v13 = vadd.f32 %v5564_v39, %v1794_v1  ;;  %v2307_v14 = vadd.f32 %v5564_v39, %v2306_v6 }
 0x1be   :  { %3259 = vst.msk [vmem:[%s6038_s3 + $0x360] sm:$0xff] %vm3150_vm3, %v3002_v8  ;;  %v1816_v15 = vadd.f32 %v5564_v39, %v3918_v10  ;;  %v4046_v16 = vpop.f32.mrb[112].mxu1  ;;  %v1807_v17 = vpop.f32.mrb[113].mxu0  ;;  %3387 = vst.msk [vmem:[%s6038_s3 + $0x760] sm:$0xff] %vm3150_vm3, %v3130_v12  ;;  %v3005_v18 = vsel %vm2493_vm15, %v1803_v63, %v2749_v52  ;;  %vm2621_vm0 = vcmp.ge.f32.partialorder %v2315_v9, 0.0 }
 0x1bf   :  { %v2877_v19 = vmul.f32 0.2, %v2315_v9  ;;  %v2328_v20 = vadd.f32 %v5564_v39, %v4046_v16  ;;  %v2319_v21 = vpop.f32.mrb[113].mxu1  ;;  %v3919_v22 = vpop.f32.mrb[114].mxu0  ;;  %3262 = vst.msk [vmem:[%s6038_s3 + $0x378] sm:$0xff] %vm3150_vm3, %v3005_v18  ;;  %vm2491_vm1 = vcmp.ge.f32.partialorder %v1795_v13, 0.0  ;;  %v1808_v32 = vadd.f32 %v5564_v39, %v1807_v17 }
 0x1c0   :  { %v2747_v23 = vmul.f32 0.2, %v1795_v13  ;;  %vm2619_vm4 = vcmp.ge.f32.partialorder %v2307_v14, 0.0  ;;  %v2875_v24 = vmul.f32 0.2, %v2307_v14  ;;  %vm2496_vm5 = vcmp.ge.f32.partialorder %v1816_v15, 0.0 }
 0x1c1   :  { %v3133_v25 = vsel %vm2621_vm0, %v2315_v9, %v2877_v19  ;;  %v2752_v26 = vmul.f32 0.2, %v1816_v15  ;;  %vm2624_vm6 = vcmp.ge.f32.partialorder %v2328_v20, 0.0  ;;  %v4047_v27 = vpop.f32.mrb[114].mxu1  ;;  %v1810_v28 = vpop.f32.mrb[115].mxu0  ;;  %v2320_v35 = vadd.f32 %v5564_v39, %v2319_v21 }
 0x1c2   :  { %3390 = vst.msk [vmem:[%s6038_s3 + $0x778] sm:$0xff] %vm3150_vm3, %v3133_v25  ;;  %v3003_v29 = vsel %vm2491_vm1, %v1795_v13, %v2747_v23  ;;  %v3131_v30 = vsel %vm2619_vm4, %v2307_v14, %v2875_v24  ;;  %v2880_v31 = vmul.f32 0.2, %v2328_v20  ;;  %v2322_v33 = vpop.f32.mrb[115].mxu1  ;;  %v1819_v36 = vadd.f32 %v5564_v39, %v3919_v22 }
 0x1c3   :  { %3260 = vst.msk [vmem:[%s6038_s3 + $0x368] sm:$0xff] %vm3150_vm3, %v3003_v29  ;;  %3388 = vst.msk [vmem:[%s6038_s3 + $0x768] sm:$0xff] %vm3150_vm3, %v3131_v30  ;;  %v3008_v34 = vsel %vm2496_vm5, %v1816_v15, %v2752_v26  ;;  %v2331_v37 = vadd.f32 %v5564_v39, %v4047_v27  ;;  %vm2494_vm7 = vcmp.ge.f32.partialorder %v1808_v32, 0.0  ;;  %v2750_v11 = vmul.f32 0.2, %v1808_v32 }
 0x1c4   :  { %3265 = vst.msk [vmem:[%s6038_s3 + $0x390] sm:$0xff] %vm3150_vm3, %v3008_v34  ;;  %v3136_v38 = vsel %vm2624_vm6, %v2328_v20, %v2880_v31  ;;  %v1811_v40 = vadd.f32 %v5564_v39, %v1810_v28  ;;  %vm2622_vm8 = vcmp.ge.f32.partialorder %v2320_v35, 0.0  ;;  %v2878_v41 = vmul.f32 0.2, %v2320_v35 }
 0x1c5   :  { %3393 = vst.msk [vmem:[%s6038_s3 + $0x790] sm:$0xff] %vm3150_vm3, %v3136_v38  ;;  %vm2497_vm9 = vcmp.ge.f32.partialorder %v1819_v36, 0.0  ;;  %v2753_v42 = vmul.f32 0.2, %v1819_v36  ;;  %v3006_v43 = vsel %vm2494_vm7, %v1808_v32, %v2750_v11  ;;  %vm2625_vm10 = vcmp.ge.f32.partialorder %v2331_v37, 0.0  ;;  %v3922_v45 = vpop.f32.mrb[116].mxu0 }
 0x1c6   :  { %v2881_v44 = vmul.f32 0.2, %v2331_v37  ;;  %vm2495_vm11 = vcmp.ge.f32.partialorder %v1811_v40, 0.0  ;;  %v4050_v46 = vpop.f32.mrb[116].mxu1  ;;  %3263 = vst.msk [vmem:[%s6038_s3 + $0x380] sm:$0xff] %vm3150_vm3, %v3006_v43  ;;  %v3134_v47 = vsel %vm2622_vm8, %v2320_v35, %v2878_v41  ;;  %v2323_v50 = vadd.f32 %v5564_v39, %v2322_v33  ;;  %v1823_v51 = vpop.f32.mrb[117].mxu0 }
 0x1c7   :  { %v3009_v48 = vsel %vm2497_vm9, %v1819_v36, %v2753_v42  ;;  %v2751_v49 = vmul.f32 0.2, %v1811_v40  ;;  %v2335_v53 = vpop.f32.mrb[117].mxu1  ;;  %3391 = vst.msk [vmem:[%s6038_s3 + $0x780] sm:$0xff] %vm3150_vm3, %v3134_v47  ;;  %v1832_v55 = vadd.f32 %v5564_v39, %v3922_v45  ;;  %v2344_v56 = vadd.f32 %v5564_v39, %v4050_v46  ;;  %v3923_v58 = vpop.f32.mrb[118].mxu0 }
 0x1c8   :  { %3266 = vst.msk [vmem:[%s6038_s3 + $0x398] sm:$0xff] %vm3150_vm3, %v3009_v48  ;;  %v3137_v54 = vsel %vm2625_vm10, %v2331_v37, %v2881_v44  ;;  %v1824_v57 = vadd.f32 %v5564_v39, %v1823_v51  ;;  %v4051_v59 = vpop.f32.mrb[118].mxu1  ;;  %vm2623_vm2 = vcmp.ge.f32.partialorder %v2323_v50, 0.0  ;;  %v2879_v61 = vmul.f32 0.2, %v2323_v50  ;;  %v1826_v63 = vpop.f32.mrb[119].mxu0 }
 0x1c9   :  { %3394 = vst.msk [vmem:[%s6038_s3 + $0x798] sm:$0xff] %vm3150_vm3, %v3137_v54  ;;  %v3007_v60 = vsel %vm2495_vm11, %v1811_v40, %v2751_v49  ;;  %v2336_v62 = vadd.f32 %v5564_v39, %v2335_v53  ;;  %v2338_v0 = vpop.f32.mrb[119].mxu1  ;;  %vm2500_vm12 = vcmp.ge.f32.partialorder %v1832_v55, 0.0  ;;  %v2756_v1 = vmul.f32 0.2, %v1832_v55 }
 0x1ca   :  { %3264 = vst.msk [vmem:[%s6038_s3 + $0x388] sm:$0xff] %vm3150_vm3, %v3007_v60  ;;  %vm2628_vm13 = vcmp.ge.f32.partialorder %v2344_v56, 0.0  ;;  %v2884_v2 = vmul.f32 0.2, %v2344_v56  ;;  %v3135_v3 = vsel %vm2623_vm2, %v2323_v50, %v2879_v61  ;;  %vm2498_vm14 = vcmp.ge.f32.partialorder %v1824_v57, 0.0 }
 0x1cb   :  { %v2754_v4 = vmul.f32 0.2, %v1824_v57  ;;  %vm2626_vm15 = vcmp.ge.f32.partialorder %v2336_v62, 0.0  ;;  %3392 = vst.msk [vmem:[%s6038_s3 + $0x788] sm:$0xff] %vm3150_vm3, %v3135_v3  ;;  %v3012_v5 = vsel %vm2500_vm12, %v1832_v55, %v2756_v1  ;;  %v2882_v7 = vmul.f32 0.2, %v2336_v62 }
 0x1cc   :  { %v3140_v6 = vsel %vm2628_vm13, %v2344_v56, %v2884_v2  ;;  %v1835_v8 = vadd.f32 %v5564_v39, %v3923_v58  ;;  %3269 = vst.msk [vmem:[%s6038_s3 + $0x3b0] sm:$0xff] %vm3150_vm3, %v3012_v5  ;;  %v2347_v9 = vadd.f32 %v5564_v39, %v4051_v59  ;;  %v1827_v10 = vadd.f32 %v5564_v39, %v1826_v63  ;;  %v4197_v5 = vld [vmem:[%s6037_s2] ss:$0 sm:$0xff] }
 0x1cd   :  { %3397 = vst.msk [vmem:[%s6038_s3 + $0x7b0] sm:$0xff] %vm3150_vm3, %v3140_v6  ;;  %v3010_v52 = vsel %vm2498_vm14, %v1824_v57, %v2754_v4  ;;  %v2339_v12 = vadd.f32 %v5564_v39, %v2338_v0  ;;  %v3926_v13 = vpop.f32.mrb[120].mxu0  ;;  %v3138_v14 = vsel %vm2626_vm15, %v2336_v62, %v2882_v7 }
 0x1ce   :  { %3267 = vst.msk [vmem:[%s6038_s3 + $0x3a0] sm:$0xff] %vm3150_vm3, %v3010_v52  ;;  %vm2501_vm0 = vcmp.ge.f32.partialorder %v1835_v8, 0.0  ;;  %v2757_v15 = vmul.f32 0.2, %v1835_v8  ;;  %v1848_v16 = vadd.f32 %v5564_v39, %v3926_v13  ;;  %v4054_v17 = vpop.f32.mrb[120].mxu1  ;;  %v1839_v18 = vpop.f32.mrb[121].mxu0 }
 0x1cf   :  { %3395 = vst.msk [vmem:[%s6038_s3 + $0x7a0] sm:$0xff] %vm3150_vm3, %v3138_v14  ;;  %vm2629_vm1 = vcmp.ge.f32.partialorder %v2347_v9, 0.0  ;;  %v2885_v19 = vmul.f32 0.2, %v2347_v9  ;;  %vm2499_vm4 = vcmp.ge.f32.partialorder %v1827_v10, 0.0  ;;  %vm2627_vm5 = vcmp.ge.f32.partialorder %v2339_v12, 0.0 }
 0x1d0   :  { %v2755_v20 = vmul.f32 0.2, %v1827_v10  ;;  %v3013_v21 = vsel %vm2501_vm0, %v1835_v8, %v2757_v15  ;;  %v2883_v22 = vmul.f32 0.2, %v2339_v12  ;;  %vm2504_vm6 = vcmp.ge.f32.partialorder %v1848_v16, 0.0  ;;  %v2351_v23 = vpop.f32.mrb[121].mxu1 }
 0x1d1   :  { %v3927_v24 = vpop.f32.mrb[122].mxu0  ;;  %3270 = vst.msk [vmem:[%s6038_s3 + $0x3b8] sm:$0xff] %vm3150_vm3, %v3013_v21  ;;  %v3141_v25 = vsel %vm2629_vm1, %v2347_v9, %v2885_v19  ;;  %v2760_v27 = vmul.f32 0.2, %v1848_v16  ;;  %v2360_v28 = vadd.f32 %v5564_v39, %v4054_v17  ;;  %v4055_v29 = vpop.f32.mrb[122].mxu1  ;;  %v1840_v32 = vadd.f32 %v5564_v39, %v1839_v18 }
 0x1d2   :  { %v3011_v26 = vsel %vm2499_vm4, %v1827_v10, %v2755_v20  ;;  %v1842_v30 = vpop.f32.mrb[123].mxu0  ;;  %3398 = vst.msk [vmem:[%s6038_s3 + $0x7b8] sm:$0xff] %vm3150_vm3, %v3141_v25  ;;  %v3139_v31 = vsel %vm2627_vm5, %v2339_v12, %v2883_v22  ;;  %v2352_v33 = vadd.f32 %v5564_v39, %v2351_v23  ;;  %v1851_v34 = vadd.f32 %v5564_v39, %v3927_v24  ;;  %v2354_v35 = vpop.f32.mrb[123].mxu1 }
 0x1d3   :  { %3268 = vst.msk [vmem:[%s6038_s3 + $0x3a8] sm:$0xff] %vm3150_vm3, %v3011_v26  ;;  %3396 = vst.msk [vmem:[%s6038_s3 + $0x7a8] sm:$0xff] %vm3150_vm3, %v3139_v31  ;;  %v3016_v36 = vsel %vm2504_vm6, %v1848_v16, %v2760_v27  ;;  %vm2632_vm7 = vcmp.ge.f32.partialorder %v2360_v28, 0.0  ;;  %v2888_v37 = vmul.f32 0.2, %v2360_v28  ;;  %v2363_v38 = vadd.f32 %v5564_v39, %v4055_v29 }
 0x1d4   :  { %3273 = vst.msk [vmem:[%s6038_s3 + $0x3d0] sm:$0xff] %vm3150_vm3, %v3016_v36  ;;  %vm2502_vm8 = vcmp.ge.f32.partialorder %v1840_v32, 0.0  ;;  %v2758_v11 = vmul.f32 0.2, %v1840_v32  ;;  %vm2630_vm9 = vcmp.ge.f32.partialorder %v2352_v33, 0.0  ;;  %vm2505_vm10 = vcmp.ge.f32.partialorder %v1851_v34, 0.0 }
 0x1d5   :  { %v2886_v40 = vmul.f32 0.2, %v2352_v33  ;;  %v3144_v41 = vsel %vm2632_vm7, %v2360_v28, %v2888_v37  ;;  %v2761_v42 = vmul.f32 0.2, %v1851_v34  ;;  %vm2633_vm11 = vcmp.ge.f32.partialorder %v2363_v38, 0.0  ;;  %v3930_v43 = vpop.f32.mrb[124].mxu0 }
 0x1d6   :  { %3401 = vst.msk [vmem:[%s6038_s3 + $0x7d0] sm:$0xff] %vm3150_vm3, %v3144_v41  ;;  %v3014_v44 = vsel %vm2502_vm8, %v1840_v32, %v2758_v11  ;;  %v2889_v46 = vmul.f32 0.2, %v2363_v38  ;;  %v1843_v47 = vadd.f32 %v5564_v39, %v1842_v30  ;;  %v4058_v48 = vpop.f32.mrb[124].mxu1  ;;  %v1855_v49 = vpop.f32.mrb[125].mxu0  ;;  %v2355_v51 = vadd.f32 %v5564_v39, %v2354_v35 }
 0x1d7   :  { %v3142_v45 = vsel %vm2630_vm9, %v2352_v33, %v2886_v40  ;;  %3271 = vst.msk [vmem:[%s6038_s3 + $0x3c0] sm:$0xff] %vm3150_vm3, %v3014_v44  ;;  %v3017_v50 = vsel %vm2505_vm10, %v1851_v34, %v2761_v42  ;;  %v1864_v53 = vadd.f32 %v5564_v39, %v3930_v43  ;;  %v2376_v54 = vadd.f32 %v5564_v39, %v4058_v48  ;;  %v2367_v55 = vpop.f32.mrb[125].mxu1  ;;  %v3931_v56 = vpop.f32.mrb[126].mxu0 }
 0x1d8   :  { %3399 = vst.msk [vmem:[%s6038_s3 + $0x7c0] sm:$0xff] %vm3150_vm3, %v3142_v45  ;;  %3274 = vst.msk [vmem:[%s6038_s3 + $0x3d8] sm:$0xff] %vm3150_vm3, %v3017_v50  ;;  %v3145_v57 = vsel %vm2633_vm11, %v2363_v38, %v2889_v46  ;;  %vm2503_vm2 = vcmp.ge.f32.partialorder %v1843_v47, 0.0  ;;  %v2759_v58 = vmul.f32 0.2, %v1843_v47  ;;  %v1856_v59 = vadd.f32 %v5564_v39, %v1855_v49  ;;  %v4059_v60 = vpop.f32.mrb[126].mxu1 }
 0x1d9   :  { %v1858_v61 = vpop.f32.mrb[127].mxu0  ;;  %3402 = vst.msk [vmem:[%s6038_s3 + $0x7d8] sm:$0xff] %vm3150_vm3, %v3145_v57  ;;  %vm2631_vm12 = vcmp.ge.f32.partialorder %v2355_v51, 0.0  ;;  %v2887_v62 = vmul.f32 0.2, %v2355_v51  ;;  %vm2508_vm13 = vcmp.ge.f32.partialorder %v1864_v53, 0.0  ;;  %v2368_v6 = vadd.f32 %v4197_v5, %v2367_v55 }
 0x1da   :  { %v2764_v63 = vmul.f32 0.2, %v1864_v53  ;;  %v3015_v0 = vsel %vm2503_vm2, %v1843_v47, %v2759_v58  ;;  %vm2636_vm14 = vcmp.ge.f32.partialorder %v2376_v54, 0.0  ;;  %v2892_v1 = vmul.f32 0.2, %v2376_v54  ;;  %v2370_v2 = vpop.f32.mrb[127].mxu1 }
 0x1db   :  { %vm2506_vm15 = vcmp.ge.f32.partialorder %v1856_v59, 0.0  ;;  %3272 = vst.msk [vmem:[%s6038_s3 + $0x3c8] sm:$0xff] %vm3150_vm3, %v3015_v0  ;;  %v3143_v39 = vsel %vm2631_vm12, %v2355_v51, %v2887_v62  ;;  %v2762_v4 = vmul.f32 0.2, %v1856_v59  ;;  %v1867_v8 = vadd.f32 %v4197_v5, %v3931_v56 }
 0x1dc   :  { %v3020_v3 = vsel %vm2508_vm13, %v1864_v53, %v2764_v63  ;;  %3400 = vst.msk [vmem:[%s6038_s3 + $0x7c8] sm:$0xff] %vm3150_vm3, %v3143_v39  ;;  %v3148_v7 = vsel %vm2636_vm14, %v2376_v54, %v2892_v1  ;;  %v2379_v52 = vadd.f32 %v4197_v5, %v4059_v60  ;;  %v1859_v9 = vadd.f32 %v4197_v5, %v1858_v61 }
 0x1dd   :  { %3277 = vst.msk [vmem:[%s6038_s3 + $0x3f0] sm:$0xff] %vm3150_vm3, %v3020_v3  ;;  %3405 = vst.msk [vmem:[%s6038_s3 + $0x7f0] sm:$0xff] %vm3150_vm3, %v3148_v7  ;;  %v3018_v10 = vsel %vm2506_vm15, %v1856_v59, %v2762_v4  ;;  %vm2634_vm0 = vcmp.ge.f32.partialorder %v2368_v6, 0.0  ;;  %v2890_v12 = vmul.f32 0.2, %v2368_v6  ;;  %v2371_v13 = vadd.f32 %v4197_v5, %v2370_v2 }
 0x1de   :  { %3275 = vst.msk [vmem:[%s6038_s3 + $0x3e0] sm:$0xff] %vm3150_vm3, %v3018_v10  ;;  %vm2509_vm1 = vcmp.ge.f32.partialorder %v1867_v8, 0.0  ;;  %v2765_v14 = vmul.f32 0.2, %v1867_v8  ;;  %vm2637_vm4 = vcmp.ge.f32.partialorder %v2379_v52, 0.0  ;;  %vm2507_vm5 = vcmp.ge.f32.partialorder %v1859_v9, 0.0 }
 0x1df   :  { %v2893_v15 = vmul.f32 0.2, %v2379_v52  ;;  %v3146_v16 = vsel %vm2634_vm0, %v2368_v6, %v2890_v12  ;;  %v2763_v17 = vmul.f32 0.2, %v1859_v9  ;;  %vm2635_vm6 = vcmp.ge.f32.partialorder %v2371_v13, 0.0 }
 0x1e0   :  { %3403 = vst.msk [vmem:[%s6038_s3 + $0x7e0] sm:$0xff] %vm3150_vm3, %v3146_v16  ;;  %v3021_v18 = vsel %vm2509_vm1, %v1867_v8, %v2765_v14  ;;  %v2891_v20 = vmul.f32 0.2, %v2371_v13 }
 0x1e1   :  { %v3149_v19 = vsel %vm2637_vm4, %v2379_v52, %v2893_v15  ;;  %3278 = vst.msk [vmem:[%s6038_s3 + $0x3f8] sm:$0xff] %vm3150_vm3, %v3021_v18  ;;  %v3019_v21 = vsel %vm2507_vm5, %v1859_v9, %v2763_v17 }
 0x1e2   :  { %3406 = vst.msk [vmem:[%s6038_s3 + $0x7f8] sm:$0xff] %vm3150_vm3, %v3149_v19  ;;  %3276 = vst.msk [vmem:[%s6038_s3 + $0x3e8] sm:$0xff] %vm3150_vm3, %v3019_v21  ;;  %v3147_v22 = vsel %vm2635_vm6, %v2371_v13, %v2891_v20 }
 0x1e3   :  { %3404 = vst.msk [vmem:[%s6038_s3 + $0x7e8] sm:$0xff] %vm3150_vm3, %v3147_v22 }

</bundles_post_ra>
